<compile_context>
chip_gen: v7x
topology: tpu7x:2x2x1
jax: 0.10.0
libtpu: 0.0.40
codegen_flags: <defaults>
</compile_context>

<pallas_src>
import math
import jax
import jax.numpy as jnp
from jax.experimental import pallas as pl
from jax.experimental.pallas import tpu as pltpu

# Small example shapes consistent with the module.
B, T, S, E, H, F = 2, 8, 8, 32, 4, 64   # batch, tgt_len, src_len, embed, heads, ff_dim
D = E // H                              # head dim
EPS = 1e-5
NEG = -1e9

# Matmul-operand dtype.  f32 for this small correctness check; at production
# sizes use bf16 on v6e/v7x (keep f32 accumulation via preferred_element_type
# and f32 LayerNorm / softmax math; v5e has no bf16 VPU/EUP).
MATMUL_DTYPE = jnp.float32


def _mm(a, b):
    return jnp.dot(a.astype(MATMUL_DTYPE), b.astype(MATMUL_DTYPE),
                   preferred_element_type=jnp.float32)


def _layer_norm(z, g, b):
    # One-pass statistics: the two reductions are independent (can overlap),
    # var = E[z^2] - mu^2 clamped at 0 for numerical safety, all in f32.
    mu = jnp.mean(z, axis=-1, keepdims=True)
    ms = jnp.mean(z * z, axis=-1, keepdims=True)
    var = jnp.maximum(ms - mu * mu, 0.0)
    return (z - mu) * jax.lax.rsqrt(var + EPS) * g + b


def _layer_norm_ref(z, g, b):
    # Two-pass form kept for the plain-JAX reference (independent spec check).
    mu = jnp.mean(z, axis=-1, keepdims=True)
    var = jnp.mean((z - mu) ** 2, axis=-1, keepdims=True)
    return (z - mu) * jax.lax.rsqrt(var + EPS) * g + b


def _mha(q, k, v, add_mask, wo, bo):
    """Head-batched attention for ONE batch element.

    q: (H, Lq, D), k/v: (H, Lk, D) -- already head-batched straight out of the
    projection (softmax scale folded into q on the host).  add_mask broadcasts
    against (H, Lq, Lk).  Returns (Lq, E), already projected through Wo.
    """
    s = jnp.einsum('hqd,hkd->hqk', q.astype(MATMUL_DTYPE), k.astype(MATMUL_DTYPE),
                   preferred_element_type=jnp.float32)            # (H, Lq, Lk)
    s = s + add_mask
    s = s - jnp.max(s, axis=-1, keepdims=True)
    p = jnp.exp(s)
    # Normalise with an EUP approx reciprocal instead of a VPU divide.
    p = p * pl.reciprocal(jnp.sum(p, axis=-1, keepdims=True), approx=True)
    o = jnp.einsum('hqk,hkd->hqd', p.astype(MATMUL_DTYPE), v.astype(MATMUL_DTYPE),
                   preferred_element_type=jnp.float32)            # (H, Lq, D)
    # Merge heads ONCE (single lane-dim relayout), then a single full-K (K=E)
    # output-projection matmul (replaces the per-head K=D matmul+add chain).
    o2 = jnp.concatenate([o[h] for h in range(H)], axis=-1)       # (Lq, E)
    return _mm(o2, wo) + bo


# ----------------------------- Pallas kernel ---------------------------------
def decoder_block_kernel(x_ref, enc_ref, dmask_ref, emask_ref,
                         w_dec_ref, b_dec_ref, w_enc_ref, b_enc_ref,
                         wo_s_ref, bo_s_ref, wo_c_ref, bo_c_ref,
                         ln_ref, w1_ref, b1_ref, w2_ref, b2_ref,
                         out_ref):
    x = x_ref[...]          # (T, E)   decoder tokens for this batch element
    enc = enc_ref[...]      # (S, E)   encoder tokens
    dmask = dmask_ref[...]  # (T, T)   additive self-attn mask
    emask = emask_ref[...]  # (T, S)   additive key-padding mask (this batch)
    ln = ln_ref[...]        # (6, E)   [g1, b1, g2, b2, g3, b3]

    # --- head-batched fused projections ---------------------------------------
    # Weights are host-packed (n, E, D) with n = proj*H + head: the head axis is
    # born on the leading dim, so no lane-granularity (D=8 << 128) slicing or
    # relayout of activations is ever needed inside the kernel.
    xb = jnp.broadcast_to(x[None], (4 * H, T, E)).astype(MATMUL_DTYPE)
    dec_p = jnp.einsum('nte,ned->ntd', xb, w_dec_ref[...].astype(MATMUL_DTYPE),
                       preferred_element_type=jnp.float32) + b_dec_ref[...]   # (4H, T, D)
    encb = jnp.broadcast_to(enc[None], (2 * H, S, E)).astype(MATMUL_DTYPE)
    enc_p = jnp.einsum('nse,ned->nsd', encb, w_enc_ref[...].astype(MATMUL_DTYPE),
                       preferred_element_type=jnp.float32) + b_enc_ref[...]   # (2H, S, D)

    # Leading-dim (cheap) slices only -- no lane extraction.
    q_s, k_s, v_s, q_c = (dec_p[0:H], dec_p[H:2 * H],
                          dec_p[2 * H:3 * H], dec_p[3 * H:4 * H])   # (H, T, D)
    k_c, v_c = enc_p[0:H], enc_p[H:2 * H]                           # (H, S, D)

    # --- self attention + residual + LN1 (dropouts are eval-mode identities) --
    sa = _mha(q_s, k_s, v_s, dmask[None], wo_s_ref[...], bo_s_ref[...])
    y1 = _layer_norm(sa + x, ln[0:1], ln[1:2])

    # --- cross attention (query = decoder_x, as in the PyTorch forward) -------
    ca = _mha(q_c, k_c, v_c, emask[None], wo_c_ref[...], bo_c_ref[...])
    y2 = _layer_norm(ca + y1, ln[2:3], ln[3:4])

    # --- feed-forward: Linear -> ReLU -> Linear, then residual + LN3 ----------
    hmid = jnp.maximum(_mm(y2, w1_ref[...]) + b1_ref[...], 0.0)
    ff = _mm(hmid, w2_ref[...]) + b2_ref[...]
    out_ref[...] = _layer_norm(ff + y2, ln[4:5], ln[5:6])           # (T, E)


# ----------------------------- host-side weight packing ------------------------
def _head_stack(w):
    """(E, E) -> (H, E, D): head h's columns [h*D:(h+1)*D] onto the leading axis."""
    return jnp.transpose(w.reshape(E, H, D), (1, 0, 2))


def _head_stack_b(b):
    """(1, E) -> (H, 1, D)."""
    return jnp.transpose(b.reshape(1, H, D), (1, 0, 2))


def pack_params(p):
    scale = 1.0 / math.sqrt(D)
    # Fold the softmax scale into the Q projections; stack heads on a leading
    # axis so in-kernel head split is a leading-dim slice of the batched output.
    w_dec = jnp.concatenate([_head_stack(p["wq_s"] * scale), _head_stack(p["wk_s"]),
                             _head_stack(p["wv_s"]), _head_stack(p["wq_c"] * scale)],
                            axis=0)                                 # (4H, E, D)
    b_dec = jnp.concatenate([_head_stack_b(p["bq_s"] * scale), _head_stack_b(p["bk_s"]),
                             _head_stack_b(p["bv_s"]), _head_stack_b(p["bq_c"] * scale)],
                            axis=0)                                 # (4H, 1, D)
    w_enc = jnp.concatenate([_head_stack(p["wk_c"]), _head_stack(p["wv_c"])], axis=0)  # (2H, E, D)
    b_enc = jnp.concatenate([_head_stack_b(p["bk_c"]), _head_stack_b(p["bv_c"])], axis=0)
    ln = jnp.concatenate([p["g1"], p["be1"], p["g2"], p["be2"],
                          p["g3"], p["be3"]], axis=0)               # (6, E)
    return w_dec, b_dec, w_enc, b_enc, ln


# ----------------------------- wrapper ----------------------------------------
def decoder_transformer_block(decoder_x, dec_mask_add, encoder_x, enc_mask_add, params):
    """decoder_x: (B,T,E), dec_mask_add: (T,T), encoder_x: (B,S,E),
    enc_mask_add: (B,1,S) additive key-padding mask.  Returns (B,T,E)."""
    w_dec, b_dec, w_enc, b_enc, ln = pack_params(params)

    x2d = decoder_x.reshape(B * T, E)
    enc2d = encoder_x.reshape(B * S, E)
    # Per-batch additive key-padding mask, broadcast over the query dim so the
    # kernel block is a simple (T, S) row tile.
    emask2d = jnp.broadcast_to(enc_mask_add.reshape(B, 1, S), (B, T, S)).reshape(B * T, S)

    args = [x2d, enc2d, dec_mask_add, emask2d,
            w_dec, b_dec, w_enc, b_enc,
            params["wo_s"], params["bo_s"], params["wo_c"], params["bo_c"],
            ln, params["w1"], params["b1"], params["w2"], params["b2"]]

    def const2(shape):
        return pl.BlockSpec(shape, lambda b: (0, 0))

    def const3(shape):
        return pl.BlockSpec(shape, lambda b: (0, 0, 0))

    in_specs = [
        pl.BlockSpec((T, E), lambda b: (b, 0)),     # x rows for batch b
        pl.BlockSpec((S, E), lambda b: (b, 0)),     # encoder rows for batch b
        pl.BlockSpec((T, T), lambda b: (0, 0)),     # shared causal mask
        pl.BlockSpec((T, S), lambda b: (b, 0)),     # per-batch key-padding mask
        # Parameters: constant index_maps -> DMA'd once, VMEM-resident across
        # the batch grid (only activations stream).
        const3(w_dec.shape), const3(b_dec.shape),
        const3(w_enc.shape), const3(b_enc.shape),
        const2(params["wo_s"].shape), const2(params["bo_s"].shape),
        const2(params["wo_c"].shape), const2(params["bo_c"].shape),
        const2(ln.shape),
        const2(params["w1"].shape), const2(params["b1"].shape),
        const2(params["w2"].shape), const2(params["b2"].shape),
    ]

    out2d = pl.pallas_call(
        decoder_block_kernel,
        out_shape=jax.ShapeDtypeStruct((B * T, E), jnp.float32),
        grid_spec=pltpu.PrefetchScalarGridSpec(
            num_scalar_prefetch=0,
            # Batch-parallel grid: uses both TensorCores on v7x; on v5e/v6e it
            # is a cheap 2-step serial loop (weights not re-fetched).
            grid=(B,),
            in_specs=in_specs,
            out_specs=pl.BlockSpec((T, E), lambda b: (b, 0)),
        ),
        compiler_params=pltpu.CompilerParams(dimension_semantics=("parallel",)),
    )(*args)
    return out2d.reshape(B, T, E)


# ----------------------------- reference (plain JAX) ---------------------------
def reference(decoder_x, dec_mask_add, encoder_x, enc_mask_add, p):
    scale = 1.0 / math.sqrt(D)

    def mha(q_in, kv_in, wq, bq, wk, bk, wv, bv, wo, bo, add_mask):
        q = q_in @ wq + bq
        k = kv_in @ wk + bk
        v = kv_in @ wv + bv
        heads = []
        for h in range(H):
            sl = slice(h * D, (h + 1) * D)
            s = (q[:, sl] * scale) @ k[:, sl].T + add_mask
            s = s - jnp.max(s, axis=-1, keepdims=True)
            pr = jnp.exp(s)
            pr = pr / jnp.sum(pr, axis=-1, keepdims=True)
            heads.append(pr @ v[:, sl])
        return jnp.concatenate(heads, axis=-1) @ wo + bo

    def one(x, enc, emask_row):
        sa = mha(x, x, p["wq_s"], p["bq_s"], p["wk_s"], p["bk_s"],
                 p["wv_s"], p["bv_s"], p["wo_s"], p["bo_s"], dec_mask_add)
        y1 = _layer_norm_ref(sa + x, p["g1"], p["be1"])
        ca = mha(x, enc, p["wq_c"], p["bq_c"], p["wk_c"], p["bk_c"],
                 p["wv_c"], p["bv_c"], p["wo_c"], p["bo_c"], emask_row)
        y2 = _layer_norm_ref(ca + y1, p["g2"], p["be2"])
        hmid = jnp.maximum(y2 @ p["w1"] + p["b1"], 0.0)
        ff = hmid @ p["w2"] + p["b2"]
        return _layer_norm_ref(ff + y2, p["g3"], p["be3"])

    return jax.vmap(one)(decoder_x, encoder_x, enc_mask_add)


# ----------------------------- parameter init ----------------------------------
def init_params(key):
    keys = jax.random.split(key, 16)
    k = iter(keys)

    def lin(kk, n_in, n_out):
        w = jax.random.normal(kk, (n_in, n_out), jnp.float32) * 0.05
        b = jnp.zeros((1, n_out), jnp.float32)
        return w, b

    p = {}
    p["wq_s"], p["bq_s"] = lin(next(k), E, E)
    p["wk_s"], p["bk_s"] = lin(next(k), E, E)
    p["wv_s"], p["bv_s"] = lin(next(k), E, E)
    p["wo_s"], p["bo_s"] = lin(next(k), E, E)
    p["wq_c"], p["bq_c"] = lin(next(k), E, E)
    p["wk_c"], p["bk_c"] = lin(next(k), E, E)
    p["wv_c"], p["bv_c"] = lin(next(k), E, E)
    p["wo_c"], p["bo_c"] = lin(next(k), E, E)
    for name in ("1", "2", "3"):
        p["g" + name] = jnp.ones((1, E), jnp.float32)
        p["be" + name] = jnp.zeros((1, E), jnp.float32)
    p["w1"], p["b1"] = lin(next(k), E, F)
    p["w2"], p["b2"] = lin(next(k), F, E)
    # non-trivial deterministic biases
    p["bq_s"] = jax.random.normal(next(k), (1, E), jnp.float32) * 0.02
    p["bo_c"] = jax.random.normal(next(k), (1, E), jnp.float32) * 0.02
    p["b1"] = jax.random.normal(next(k), (1, F), jnp.float32) * 0.02
    return p


if __name__ == "__main__":
    key = jax.random.PRNGKey(0)
    k_x, k_e, k_p = jax.random.split(key, 3)

    decoder_x = jax.random.normal(k_x, (B, T, E), jnp.float32)
    encoder_x = jax.random.normal(k_e, (B, S, E), jnp.float32)

    # decoder_mask: causal additive mask (float), 0 = attend, NEG = blocked.
    causal = jnp.tril(jnp.ones((T, T), jnp.bool_))
    dec_mask_add = jnp.where(causal, 0.0, NEG).astype(jnp.float32)

    # encoder key_padding_mask: True = pad.  Batch 0: no pad, batch 1: last 2 padded.
    pad = jnp.array([[False] * S,
                     [False] * (S - 2) + [True] * 2], dtype=jnp.bool_)
    enc_mask_add = jnp.where(pad, NEG, 0.0).astype(jnp.float32)[:, None, :]  # (B,1,S)

    params = init_params(k_p)

    out = decoder_transformer_block(decoder_x, dec_mask_add, encoder_x,
                                    enc_mask_add, params)
    out = jax.block_until_ready(out)

    ref = reference(decoder_x, dec_mask_add, encoder_x, enc_mask_add, params)
    assert out.shape == (B, T, E)
    # Tolerance accounts for the EUP approx-reciprocal softmax normalisation
    # (~1e-4-level relative error vs. the exact-division reference).
    assert jnp.allclose(out, ref, atol=2e-3, rtol=2e-3), "mismatch vs reference"

    # TODO(synk): dropout layers and `need_weights` attention-score outputs are
    # eval-mode identities / unused, so they are intentionally not materialized.
    print("KERNEL_OK")
</pallas_src>

<mosaic_0001>
module attributes {stable_mosaic.version = 11 : i64} {
  func.func @decoder_block_kernel(%arg0: i32, %arg1: memref<8x32xf32, #tpu.memory_space<vmem>>, %arg2: memref<8x32xf32, #tpu.memory_space<vmem>>, %arg3: memref<8x8xf32, #tpu.memory_space<vmem>>, %arg4: memref<8x8xf32, #tpu.memory_space<vmem>>, %arg5: memref<16x32x8xf32, #tpu.memory_space<vmem>>, %arg6: memref<16x1x8xf32, #tpu.memory_space<vmem>>, %arg7: memref<8x32x8xf32, #tpu.memory_space<vmem>>, %arg8: memref<8x1x8xf32, #tpu.memory_space<vmem>>, %arg9: memref<32x32xf32, #tpu.memory_space<vmem>>, %arg10: memref<1x32xf32, #tpu.memory_space<vmem>>, %arg11: memref<32x32xf32, #tpu.memory_space<vmem>>, %arg12: memref<1x32xf32, #tpu.memory_space<vmem>>, %arg13: memref<6x32xf32, #tpu.memory_space<vmem>>, %arg14: memref<32x64xf32, #tpu.memory_space<vmem>>, %arg15: memref<1x64xf32, #tpu.memory_space<vmem>>, %arg16: memref<64x32xf32, #tpu.memory_space<vmem>>, %arg17: memref<1x32xf32, #tpu.memory_space<vmem>>, %arg18: memref<8x32xf32, #tpu.memory_space<vmem>>) attributes {dimension_semantics = [#tpu.dimension_semantics<parallel>], iteration_bounds = array<i64: 2>, scalar_prefetch = 0 : i64, scratch_operands = 0 : i64, tpu.core_type = #tpu.core_type<tc>, window_params = [{transform_indices = @transform_0, window_bounds = array<i64: 8, 32>}, {transform_indices = @transform_1, window_bounds = array<i64: 8, 32>}, {pipeline_mode = #tpu.pipeline_mode<synchronous>, transform_indices = @transform_2, window_bounds = array<i64: 8, 8>}, {transform_indices = @transform_3, window_bounds = array<i64: 8, 8>}, {pipeline_mode = #tpu.pipeline_mode<synchronous>, transform_indices = @transform_4, window_bounds = array<i64: 16, 32, 8>}, {pipeline_mode = #tpu.pipeline_mode<synchronous>, transform_indices = @transform_5, window_bounds = array<i64: 16, 1, 8>}, {pipeline_mode = #tpu.pipeline_mode<synchronous>, transform_indices = @transform_6, window_bounds = array<i64: 8, 32, 8>}, {pipeline_mode = #tpu.pipeline_mode<synchronous>, transform_indices = @transform_7, window_bounds = array<i64: 8, 1, 8>}, {pipeline_mode = #tpu.pipeline_mode<synchronous>, transform_indices = @transform_8, window_bounds = array<i64: 32, 32>}, {pipeline_mode = #tpu.pipeline_mode<synchronous>, transform_indices = @transform_9, window_bounds = array<i64: 1, 32>}, {pipeline_mode = #tpu.pipeline_mode<synchronous>, transform_indices = @transform_10, window_bounds = array<i64: 32, 32>}, {pipeline_mode = #tpu.pipeline_mode<synchronous>, transform_indices = @transform_11, window_bounds = array<i64: 1, 32>}, {pipeline_mode = #tpu.pipeline_mode<synchronous>, transform_indices = @transform_12, window_bounds = array<i64: 6, 32>}, {pipeline_mode = #tpu.pipeline_mode<synchronous>, transform_indices = @transform_13, window_bounds = array<i64: 32, 64>}, {pipeline_mode = #tpu.pipeline_mode<synchronous>, transform_indices = @transform_14, window_bounds = array<i64: 1, 64>}, {pipeline_mode = #tpu.pipeline_mode<synchronous>, transform_indices = @transform_15, window_bounds = array<i64: 64, 32>}, {pipeline_mode = #tpu.pipeline_mode<synchronous>, transform_indices = @transform_16, window_bounds = array<i64: 1, 32>}, {transform_indices = @transform_17, window_bounds = array<i64: 8, 32>}]} {
    %c0 = arith.constant 0 : index
    %c0_0 = arith.constant 0 : index
    %0 = vector.load %arg1[%c0, %c0_0] : memref<8x32xf32, #tpu.memory_space<vmem>>, vector<8x32xf32>
    %c0_1 = arith.constant 0 : index
    %c0_2 = arith.constant 0 : index
    %1 = vector.load %arg2[%c0_1, %c0_2] : memref<8x32xf32, #tpu.memory_space<vmem>>, vector<8x32xf32>
    %c0_3 = arith.constant 0 : index
    %c0_4 = arith.constant 0 : index
    %2 = vector.load %arg3[%c0_3, %c0_4] : memref<8x8xf32, #tpu.memory_space<vmem>>, vector<8x8xf32>
    %c0_5 = arith.constant 0 : index
    %c0_6 = arith.constant 0 : index
    %3 = vector.load %arg4[%c0_5, %c0_6] : memref<8x8xf32, #tpu.memory_space<vmem>>, vector<8x8xf32>
    %c0_7 = arith.constant 0 : index
    %c0_8 = arith.constant 0 : index
    %4 = vector.load %arg13[%c0_7, %c0_8] : memref<6x32xf32, #tpu.memory_space<vmem>>, vector<6x32xf32>
    %5 = vector.shape_cast %0 : vector<8x32xf32> to vector<1x8x32xf32>
    %6 = vector.shape_cast %5 : vector<1x8x32xf32> to vector<1x8x32xf32>
    %7 = vector.broadcast %6 : vector<1x8x32xf32> to vector<16x8x32xf32>
    %c0_9 = arith.constant 0 : index
    %c0_10 = arith.constant 0 : index
    %c0_11 = arith.constant 0 : index
    %8 = vector.load %arg5[%c0_9, %c0_10, %c0_11] : memref<16x32x8xf32, #tpu.memory_space<vmem>>, vector<16x32x8xf32>
    "tpu.trace_start"() <{level = 10 : i32, message = "nte,ned->ntd"}> : () -> ()
    %cst = arith.constant dense<0.000000e+00> : vector<16x8x8xf32>
    %9 = tpu.matmul %7, %8, %cst {dimension_numbers = #tpu.dot_dimension_numbers<[2], [1], [1], [2], [0, 0, 0, 1, 1, 2], [0], [0]>} : vector<16x8x32xf32>, vector<16x32x8xf32>, vector<16x8x8xf32> -> vector<16x8x8xf32>
    "tpu.trace_stop"() : () -> ()
    %c0_12 = arith.constant 0 : index
    %c0_13 = arith.constant 0 : index
    %c0_14 = arith.constant 0 : index
    %10 = vector.load %arg6[%c0_12, %c0_13, %c0_14] : memref<16x1x8xf32, #tpu.memory_space<vmem>>, vector<16x1x8xf32>
    %11 = vector.broadcast %10 : vector<16x1x8xf32> to vector<16x8x8xf32>
    %12 = arith.addf %9, %11 : vector<16x8x8xf32>
    %13 = vector.shape_cast %1 : vector<8x32xf32> to vector<1x8x32xf32>
    %14 = vector.shape_cast %13 : vector<1x8x32xf32> to vector<1x8x32xf32>
    %15 = vector.broadcast %14 : vector<1x8x32xf32> to vector<8x8x32xf32>
    %c0_15 = arith.constant 0 : index
    %c0_16 = arith.constant 0 : index
    %c0_17 = arith.constant 0 : index
    %16 = vector.load %arg7[%c0_15, %c0_16, %c0_17] : memref<8x32x8xf32, #tpu.memory_space<vmem>>, vector<8x32x8xf32>
    "tpu.trace_start"() <{level = 10 : i32, message = "nse,ned->nsd"}> : () -> ()
    %cst_18 = arith.constant dense<0.000000e+00> : vector<8x8x8xf32>
    %17 = tpu.matmul %15, %16, %cst_18 {dimension_numbers = #tpu.dot_dimension_numbers<[2], [1], [1], [2], [0, 0, 0, 1, 1, 2], [0], [0]>} : vector<8x8x32xf32>, vector<8x32x8xf32>, vector<8x8x8xf32> -> vector<8x8x8xf32>
    "tpu.trace_stop"() : () -> ()
    %c0_19 = arith.constant 0 : index
    %c0_20 = arith.constant 0 : index
    %c0_21 = arith.constant 0 : index
    %18 = vector.load %arg8[%c0_19, %c0_20, %c0_21] : memref<8x1x8xf32, #tpu.memory_space<vmem>>, vector<8x1x8xf32>
    %19 = vector.broadcast %18 : vector<8x1x8xf32> to vector<8x8x8xf32>
    %20 = arith.addf %17, %19 : vector<8x8x8xf32>
    %21 = vector.extract_strided_slice %12 {offsets = [0, 0, 0], sizes = [4, 8, 8], strides = [1, 1, 1]} : vector<16x8x8xf32> to vector<4x8x8xf32>
    %22 = vector.extract_strided_slice %12 {offsets = [4, 0, 0], sizes = [4, 8, 8], strides = [1, 1, 1]} : vector<16x8x8xf32> to vector<4x8x8xf32>
    %23 = vector.extract_strided_slice %12 {offsets = [8, 0, 0], sizes = [4, 8, 8], strides = [1, 1, 1]} : vector<16x8x8xf32> to vector<4x8x8xf32>
    %24 = vector.extract_strided_slice %12 {offsets = [12, 0, 0], sizes = [4, 8, 8], strides = [1, 1, 1]} : vector<16x8x8xf32> to vector<4x8x8xf32>
    %25 = vector.extract_strided_slice %20 {offsets = [0, 0, 0], sizes = [4, 8, 8], strides = [1, 1, 1]} : vector<8x8x8xf32> to vector<4x8x8xf32>
    %26 = vector.extract_strided_slice %20 {offsets = [4, 0, 0], sizes = [4, 8, 8], strides = [1, 1, 1]} : vector<8x8x8xf32> to vector<4x8x8xf32>
    %27 = vector.shape_cast %2 : vector<8x8xf32> to vector<1x8x8xf32>
    %c0_22 = arith.constant 0 : index
    %c0_23 = arith.constant 0 : index
    %28 = vector.load %arg9[%c0_22, %c0_23] : memref<32x32xf32, #tpu.memory_space<vmem>>, vector<32x32xf32>
    %c0_24 = arith.constant 0 : index
    %c0_25 = arith.constant 0 : index
    %29 = vector.load %arg10[%c0_24, %c0_25] : memref<1x32xf32, #tpu.memory_space<vmem>>, vector<1x32xf32>
    "tpu.trace_start"() <{level = 10 : i32, message = "hqd,hkd->hqk"}> : () -> ()
    %cst_26 = arith.constant dense<0.000000e+00> : vector<4x8x8xf32>
    %30 = tpu.matmul %21, %22, %cst_26 {dimension_numbers = #tpu.dot_dimension_numbers<[2], [2], [1], [1], [0, 0, 0, 1, 1, 1], [0], [0]>} : vector<4x8x8xf32>, vector<4x8x8xf32>, vector<4x8x8xf32> -> vector<4x8x8xf32>
    "tpu.trace_stop"() : () -> ()
    %31 = vector.broadcast %27 : vector<1x8x8xf32> to vector<4x8x8xf32>
    %32 = arith.addf %30, %31 : vector<4x8x8xf32>
    %cst_27 = arith.constant dense<0xFF800000> : vector<4x8xf32>
    %33 = vector.multi_reduction <maximumf>, %32, %cst_27 [2] : vector<4x8x8xf32> to vector<4x8xf32>
    %34 = vector.shape_cast %33 : vector<4x8xf32> to vector<4x8x1xf32>
    %35 = vector.broadcast %34 : vector<4x8x1xf32> to vector<4x8x8xf32>
    %36 = arith.subf %32, %35 : vector<4x8x8xf32>
    %37 = math.exp %36 : vector<4x8x8xf32>
    %cst_28 = arith.constant dense<0.000000e+00> : vector<4x8xf32>
    %38 = vector.multi_reduction <add>, %37, %cst_28 [2] : vector<4x8x8xf32> to vector<4x8xf32>
    %39 = vector.shape_cast %38 : vector<4x8xf32> to vector<4x8x1xf32>
    %40 = tpu.reciprocal %39 {approx = true} : vector<4x8x1xf32> -> vector<4x8x1xf32>
    %41 = vector.broadcast %40 : vector<4x8x1xf32> to vector<4x8x8xf32>
    %42 = arith.mulf %37, %41 : vector<4x8x8xf32>
    "tpu.trace_start"() <{level = 10 : i32, message = "hqk,hkd->hqd"}> : () -> ()
    %cst_29 = arith.constant dense<0.000000e+00> : vector<4x8x8xf32>
    %43 = tpu.matmul %42, %23, %cst_29 {dimension_numbers = #tpu.dot_dimension_numbers<[2], [1], [1], [2], [0, 0, 0, 1, 1, 2], [0], [0]>} : vector<4x8x8xf32>, vector<4x8x8xf32>, vector<4x8x8xf32> -> vector<4x8x8xf32>
    "tpu.trace_stop"() : () -> ()
    %44 = vector.extract_strided_slice %43 {offsets = [0, 0, 0], sizes = [1, 8, 8], strides = [1, 1, 1]} : vector<4x8x8xf32> to vector<1x8x8xf32>
    %45 = vector.shape_cast %44 : vector<1x8x8xf32> to vector<8x8xf32>
    %46 = vector.extract_strided_slice %43 {offsets = [1, 0, 0], sizes = [1, 8, 8], strides = [1, 1, 1]} : vector<4x8x8xf32> to vector<1x8x8xf32>
    %47 = vector.shape_cast %46 : vector<1x8x8xf32> to vector<8x8xf32>
    %48 = vector.extract_strided_slice %43 {offsets = [2, 0, 0], sizes = [1, 8, 8], strides = [1, 1, 1]} : vector<4x8x8xf32> to vector<1x8x8xf32>
    %49 = vector.shape_cast %48 : vector<1x8x8xf32> to vector<8x8xf32>
    %50 = vector.extract_strided_slice %43 {offsets = [3, 0, 0], sizes = [1, 8, 8], strides = [1, 1, 1]} : vector<4x8x8xf32> to vector<1x8x8xf32>
    %51 = vector.shape_cast %50 : vector<1x8x8xf32> to vector<8x8xf32>
    %52 = tpu.concatenate %45, %47, %49, %51 in 1 : vector<8x8xf32>, vector<8x8xf32>, vector<8x8xf32>, vector<8x8xf32> -> vector<8x32xf32>
    %cst_30 = arith.constant dense<0.000000e+00> : vector<8x32xf32>
    %53 = tpu.matmul %52, %28, %cst_30 {dimension_numbers = #tpu.dot_dimension_numbers<[1], [0], [0], [1], [0, 0, 1, 1], [], []>} : vector<8x32xf32>, vector<32x32xf32>, vector<8x32xf32> -> vector<8x32xf32>
    %54 = vector.broadcast %29 : vector<1x32xf32> to vector<8x32xf32>
    %55 = arith.addf %53, %54 : vector<8x32xf32>
    %56 = arith.addf %55, %0 : vector<8x32xf32>
    %57 = vector.extract_strided_slice %4 {offsets = [0, 0], sizes = [1, 32], strides = [1, 1]} : vector<6x32xf32> to vector<1x32xf32>
    %58 = vector.extract_strided_slice %4 {offsets = [1, 0], sizes = [1, 32], strides = [1, 1]} : vector<6x32xf32> to vector<1x32xf32>
    %cst_31 = arith.constant dense<0.000000e+00> : vector<8xf32>
    %59 = vector.multi_reduction <add>, %56, %cst_31 [1] : vector<8x32xf32> to vector<8xf32>
    %60 = vector.shape_cast %59 : vector<8xf32> to vector<8x1xf32>
    %cst_32 = arith.constant 3.200000e+01 : f32
    %61 = vector.broadcast %cst_32 : f32 to vector<8x1xf32>
    %62 = arith.divf %60, %61 : vector<8x1xf32>
    %63 = arith.mulf %56, %56 : vector<8x32xf32>
    %cst_33 = arith.constant dense<0.000000e+00> : vector<8xf32>
    %64 = vector.multi_reduction <add>, %63, %cst_33 [1] : vector<8x32xf32> to vector<8xf32>
    %65 = vector.shape_cast %64 : vector<8xf32> to vector<8x1xf32>
    %cst_34 = arith.constant 3.200000e+01 : f32
    %66 = vector.broadcast %cst_34 : f32 to vector<8x1xf32>
    %67 = arith.divf %65, %66 : vector<8x1xf32>
    %68 = arith.mulf %62, %62 : vector<8x1xf32>
    %69 = arith.subf %67, %68 : vector<8x1xf32>
    %cst_35 = arith.constant 0.000000e+00 : f32
    %70 = vector.broadcast %cst_35 : f32 to vector<8x1xf32>
    %71 = arith.maximumf %69, %70 : vector<8x1xf32>
    %72 = vector.broadcast %62 : vector<8x1xf32> to vector<8x32xf32>
    %73 = arith.subf %56, %72 : vector<8x32xf32>
    %cst_36 = arith.constant 9.99999974E-6 : f32
    %74 = vector.broadcast %cst_36 : f32 to vector<8x1xf32>
    %75 = arith.addf %71, %74 : vector<8x1xf32>
    %76 = math.rsqrt %75 : vector<8x1xf32>
    %77 = vector.broadcast %76 : vector<8x1xf32> to vector<8x32xf32>
    %78 = arith.mulf %73, %77 : vector<8x32xf32>
    %79 = vector.broadcast %57 : vector<1x32xf32> to vector<8x32xf32>
    %80 = arith.mulf %78, %79 : vector<8x32xf32>
    %81 = vector.broadcast %58 : vector<1x32xf32> to vector<8x32xf32>
    %82 = arith.addf %80, %81 : vector<8x32xf32>
    %83 = vector.shape_cast %3 : vector<8x8xf32> to vector<1x8x8xf32>
    %c0_37 = arith.constant 0 : index
    %c0_38 = arith.constant 0 : index
    %84 = vector.load %arg11[%c0_37, %c0_38] : memref<32x32xf32, #tpu.memory_space<vmem>>, vector<32x32xf32>
    %c0_39 = arith.constant 0 : index
    %c0_40 = arith.constant 0 : index
    %85 = vector.load %arg12[%c0_39, %c0_40] : memref<1x32xf32, #tpu.memory_space<vmem>>, vector<1x32xf32>
    "tpu.trace_start"() <{level = 10 : i32, message = "hqd,hkd->hqk"}> : () -> ()
    %cst_41 = arith.constant dense<0.000000e+00> : vector<4x8x8xf32>
    %86 = tpu.matmul %24, %25, %cst_41 {dimension_numbers = #tpu.dot_dimension_numbers<[2], [2], [1], [1], [0, 0, 0, 1, 1, 1], [0], [0]>} : vector<4x8x8xf32>, vector<4x8x8xf32>, vector<4x8x8xf32> -> vector<4x8x8xf32>
    "tpu.trace_stop"() : () -> ()
    %87 = vector.broadcast %83 : vector<1x8x8xf32> to vector<4x8x8xf32>
    %88 = arith.addf %86, %87 : vector<4x8x8xf32>
    %cst_42 = arith.constant dense<0xFF800000> : vector<4x8xf32>
    %89 = vector.multi_reduction <maximumf>, %88, %cst_42 [2] : vector<4x8x8xf32> to vector<4x8xf32>
    %90 = vector.shape_cast %89 : vector<4x8xf32> to vector<4x8x1xf32>
    %91 = vector.broadcast %90 : vector<4x8x1xf32> to vector<4x8x8xf32>
    %92 = arith.subf %88, %91 : vector<4x8x8xf32>
    %93 = math.exp %92 : vector<4x8x8xf32>
    %cst_43 = arith.constant dense<0.000000e+00> : vector<4x8xf32>
    %94 = vector.multi_reduction <add>, %93, %cst_43 [2] : vector<4x8x8xf32> to vector<4x8xf32>
    %95 = vector.shape_cast %94 : vector<4x8xf32> to vector<4x8x1xf32>
    %96 = tpu.reciprocal %95 {approx = true} : vector<4x8x1xf32> -> vector<4x8x1xf32>
    %97 = vector.broadcast %96 : vector<4x8x1xf32> to vector<4x8x8xf32>
    %98 = arith.mulf %93, %97 : vector<4x8x8xf32>
    "tpu.trace_start"() <{level = 10 : i32, message = "hqk,hkd->hqd"}> : () -> ()
    %cst_44 = arith.constant dense<0.000000e+00> : vector<4x8x8xf32>
    %99 = tpu.matmul %98, %26, %cst_44 {dimension_numbers = #tpu.dot_dimension_numbers<[2], [1], [1], [2], [0, 0, 0, 1, 1, 2], [0], [0]>} : vector<4x8x8xf32>, vector<4x8x8xf32>, vector<4x8x8xf32> -> vector<4x8x8xf32>
    "tpu.trace_stop"() : () -> ()
    %100 = vector.extract_strided_slice %99 {offsets = [0, 0, 0], sizes = [1, 8, 8], strides = [1, 1, 1]} : vector<4x8x8xf32> to vector<1x8x8xf32>
    %101 = vector.shape_cast %100 : vector<1x8x8xf32> to vector<8x8xf32>
    %102 = vector.extract_strided_slice %99 {offsets = [1, 0, 0], sizes = [1, 8, 8], strides = [1, 1, 1]} : vector<4x8x8xf32> to vector<1x8x8xf32>
    %103 = vector.shape_cast %102 : vector<1x8x8xf32> to vector<8x8xf32>
    %104 = vector.extract_strided_slice %99 {offsets = [2, 0, 0], sizes = [1, 8, 8], strides = [1, 1, 1]} : vector<4x8x8xf32> to vector<1x8x8xf32>
    %105 = vector.shape_cast %104 : vector<1x8x8xf32> to vector<8x8xf32>
    %106 = vector.extract_strided_slice %99 {offsets = [3, 0, 0], sizes = [1, 8, 8], strides = [1, 1, 1]} : vector<4x8x8xf32> to vector<1x8x8xf32>
    %107 = vector.shape_cast %106 : vector<1x8x8xf32> to vector<8x8xf32>
    %108 = tpu.concatenate %101, %103, %105, %107 in 1 : vector<8x8xf32>, vector<8x8xf32>, vector<8x8xf32>, vector<8x8xf32> -> vector<8x32xf32>
    %cst_45 = arith.constant dense<0.000000e+00> : vector<8x32xf32>
    %109 = tpu.matmul %108, %84, %cst_45 {dimension_numbers = #tpu.dot_dimension_numbers<[1], [0], [0], [1], [0, 0, 1, 1], [], []>} : vector<8x32xf32>, vector<32x32xf32>, vector<8x32xf32> -> vector<8x32xf32>
    %110 = vector.broadcast %85 : vector<1x32xf32> to vector<8x32xf32>
    %111 = arith.addf %109, %110 : vector<8x32xf32>
    %112 = arith.addf %111, %82 : vector<8x32xf32>
    %113 = vector.extract_strided_slice %4 {offsets = [2, 0], sizes = [1, 32], strides = [1, 1]} : vector<6x32xf32> to vector<1x32xf32>
    %114 = vector.extract_strided_slice %4 {offsets = [3, 0], sizes = [1, 32], strides = [1, 1]} : vector<6x32xf32> to vector<1x32xf32>
    %cst_46 = arith.constant dense<0.000000e+00> : vector<8xf32>
    %115 = vector.multi_reduction <add>, %112, %cst_46 [1] : vector<8x32xf32> to vector<8xf32>
    %116 = vector.shape_cast %115 : vector<8xf32> to vector<8x1xf32>
    %cst_47 = arith.constant 3.200000e+01 : f32
    %117 = vector.broadcast %cst_47 : f32 to vector<8x1xf32>
    %118 = arith.divf %116, %117 : vector<8x1xf32>
    %119 = arith.mulf %112, %112 : vector<8x32xf32>
    %cst_48 = arith.constant dense<0.000000e+00> : vector<8xf32>
    %120 = vector.multi_reduction <add>, %119, %cst_48 [1] : vector<8x32xf32> to vector<8xf32>
    %121 = vector.shape_cast %120 : vector<8xf32> to vector<8x1xf32>
    %cst_49 = arith.constant 3.200000e+01 : f32
    %122 = vector.broadcast %cst_49 : f32 to vector<8x1xf32>
    %123 = arith.divf %121, %122 : vector<8x1xf32>
    %124 = arith.mulf %118, %118 : vector<8x1xf32>
    %125 = arith.subf %123, %124 : vector<8x1xf32>
    %cst_50 = arith.constant 0.000000e+00 : f32
    %126 = vector.broadcast %cst_50 : f32 to vector<8x1xf32>
    %127 = arith.maximumf %125, %126 : vector<8x1xf32>
    %128 = vector.broadcast %118 : vector<8x1xf32> to vector<8x32xf32>
    %129 = arith.subf %112, %128 : vector<8x32xf32>
    %cst_51 = arith.constant 9.99999974E-6 : f32
    %130 = vector.broadcast %cst_51 : f32 to vector<8x1xf32>
    %131 = arith.addf %127, %130 : vector<8x1xf32>
    %132 = math.rsqrt %131 : vector<8x1xf32>
    %133 = vector.broadcast %132 : vector<8x1xf32> to vector<8x32xf32>
    %134 = arith.mulf %129, %133 : vector<8x32xf32>
    %135 = vector.broadcast %113 : vector<1x32xf32> to vector<8x32xf32>
    %136 = arith.mulf %134, %135 : vector<8x32xf32>
    %137 = vector.broadcast %114 : vector<1x32xf32> to vector<8x32xf32>
    %138 = arith.addf %136, %137 : vector<8x32xf32>
    %c0_52 = arith.constant 0 : index
    %c0_53 = arith.constant 0 : index
    %139 = vector.load %arg14[%c0_52, %c0_53] : memref<32x64xf32, #tpu.memory_space<vmem>>, vector<32x64xf32>
    %cst_54 = arith.constant dense<0.000000e+00> : vector<8x64xf32>
    %140 = tpu.matmul %138, %139, %cst_54 {dimension_numbers = #tpu.dot_dimension_numbers<[1], [0], [0], [1], [0, 0, 1, 1], [], []>} : vector<8x32xf32>, vector<32x64xf32>, vector<8x64xf32> -> vector<8x64xf32>
    %c0_55 = arith.constant 0 : index
    %c0_56 = arith.constant 0 : index
    %141 = vector.load %arg15[%c0_55, %c0_56] : memref<1x64xf32, #tpu.memory_space<vmem>>, vector<1x64xf32>
    %142 = vector.broadcast %141 : vector<1x64xf32> to vector<8x64xf32>
    %143 = arith.addf %140, %142 : vector<8x64xf32>
    %cst_57 = arith.constant 0.000000e+00 : f32
    %144 = vector.broadcast %cst_57 : f32 to vector<8x64xf32>
    %145 = arith.maximumf %143, %144 : vector<8x64xf32>
    %c0_58 = arith.constant 0 : index
    %c0_59 = arith.constant 0 : index
    %146 = vector.load %arg16[%c0_58, %c0_59] : memref<64x32xf32, #tpu.memory_space<vmem>>, vector<64x32xf32>
    %cst_60 = arith.constant dense<0.000000e+00> : vector<8x32xf32>
    %147 = tpu.matmul %145, %146, %cst_60 {dimension_numbers = #tpu.dot_dimension_numbers<[1], [0], [0], [1], [0, 0, 1, 1], [], []>} : vector<8x64xf32>, vector<64x32xf32>, vector<8x32xf32> -> vector<8x32xf32>
    %c0_61 = arith.constant 0 : index
    %c0_62 = arith.constant 0 : index
    %148 = vector.load %arg17[%c0_61, %c0_62] : memref<1x32xf32, #tpu.memory_space<vmem>>, vector<1x32xf32>
    %149 = vector.broadcast %148 : vector<1x32xf32> to vector<8x32xf32>
    %150 = arith.addf %147, %149 : vector<8x32xf32>
    %151 = arith.addf %150, %138 : vector<8x32xf32>
    %152 = vector.extract_strided_slice %4 {offsets = [4, 0], sizes = [1, 32], strides = [1, 1]} : vector<6x32xf32> to vector<1x32xf32>
    %153 = vector.extract_strided_slice %4 {offsets = [5, 0], sizes = [1, 32], strides = [1, 1]} : vector<6x32xf32> to vector<1x32xf32>
    %cst_63 = arith.constant dense<0.000000e+00> : vector<8xf32>
    %154 = vector.multi_reduction <add>, %151, %cst_63 [1] : vector<8x32xf32> to vector<8xf32>
    %155 = vector.shape_cast %154 : vector<8xf32> to vector<8x1xf32>
    %cst_64 = arith.constant 3.200000e+01 : f32
    %156 = vector.broadcast %cst_64 : f32 to vector<8x1xf32>
    %157 = arith.divf %155, %156 : vector<8x1xf32>
    %158 = arith.mulf %151, %151 : vector<8x32xf32>
    %cst_65 = arith.constant dense<0.000000e+00> : vector<8xf32>
    %159 = vector.multi_reduction <add>, %158, %cst_65 [1] : vector<8x32xf32> to vector<8xf32>
    %160 = vector.shape_cast %159 : vector<8xf32> to vector<8x1xf32>
    %cst_66 = arith.constant 3.200000e+01 : f32
    %161 = vector.broadcast %cst_66 : f32 to vector<8x1xf32>
    %162 = arith.divf %160, %161 : vector<8x1xf32>
    %163 = arith.mulf %157, %157 : vector<8x1xf32>
    %164 = arith.subf %162, %163 : vector<8x1xf32>
    %cst_67 = arith.constant 0.000000e+00 : f32
    %165 = vector.broadcast %cst_67 : f32 to vector<8x1xf32>
    %166 = arith.maximumf %164, %165 : vector<8x1xf32>
    %167 = vector.broadcast %157 : vector<8x1xf32> to vector<8x32xf32>
    %168 = arith.subf %151, %167 : vector<8x32xf32>
    %cst_68 = arith.constant 9.99999974E-6 : f32
    %169 = vector.broadcast %cst_68 : f32 to vector<8x1xf32>
    %170 = arith.addf %166, %169 : vector<8x1xf32>
    %171 = math.rsqrt %170 : vector<8x1xf32>
    %172 = vector.broadcast %171 : vector<8x1xf32> to vector<8x32xf32>
    %173 = arith.mulf %168, %172 : vector<8x32xf32>
    %174 = vector.broadcast %152 : vector<1x32xf32> to vector<8x32xf32>
    %175 = arith.mulf %173, %174 : vector<8x32xf32>
    %176 = vector.broadcast %153 : vector<1x32xf32> to vector<8x32xf32>
    %177 = arith.addf %175, %176 : vector<8x32xf32>
    %c0_69 = arith.constant 0 : index
    %c0_70 = arith.constant 0 : index
    %178 = vector.load %arg18[%c0_69, %c0_70] : memref<8x32xf32, #tpu.memory_space<vmem>>, vector<8x32xf32>
    tpu.vector_store %arg18[%c0_69, %c0_70], %177 {strides = array<i32>} : memref<8x32xf32, #tpu.memory_space<vmem>>, vector<8x32xf32>,
    return
  }
  func.func @transform_0(%arg0: i32) -> (i32, i32) {
    %c0_i32 = arith.constant 0 : i32
    %c0_i32_0 = arith.constant 0 : i32
    return %arg0, %c0_i32 : i32, i32
  }
  func.func @transform_1(%arg0: i32) -> (i32, i32) {
    %c0_i32 = arith.constant 0 : i32
    %c0_i32_0 = arith.constant 0 : i32
    return %arg0, %c0_i32 : i32, i32
  }
  func.func @transform_2(%arg0: i32) -> (i32, i32) {
    %c0_i32 = arith.constant 0 : i32
    %c0_i32_0 = arith.constant 0 : i32
    %c0_i32_1 = arith.constant 0 : i32
    return %c0_i32, %c0_i32_0 : i32, i32
  }
  func.func @transform_3(%arg0: i32) -> (i32, i32) {
    %c0_i32 = arith.constant 0 : i32
    %c0_i32_0 = arith.constant 0 : i32
    return %arg0, %c0_i32 : i32, i32
  }
  func.func @transform_4(%arg0: i32) -> (i32, i32, i32) {
    %c0_i32 = arith.constant 0 : i32
    %c0_i32_0 = arith.constant 0 : i32
    %c0_i32_1 = arith.constant 0 : i32
    %c0_i32_2 = arith.constant 0 : i32
    return %c0_i32, %c0_i32_0, %c0_i32_1 : i32, i32, i32
  }
  func.func @transform_5(%arg0: i32) -> (i32, i32, i32) {
    %c0_i32 = arith.constant 0 : i32
    %c0_i32_0 = arith.constant 0 : i32
    %c0_i32_1 = arith.constant 0 : i32
    %c0_i32_2 = arith.constant 0 : i32
    return %c0_i32, %c0_i32_0, %c0_i32_1 : i32, i32, i32
  }
  func.func @transform_6(%arg0: i32) -> (i32, i32, i32) {
    %c0_i32 = arith.constant 0 : i32
    %c0_i32_0 = arith.constant 0 : i32
    %c0_i32_1 = arith.constant 0 : i32
    %c0_i32_2 = arith.constant 0 : i32
    return %c0_i32, %c0_i32_0, %c0_i32_1 : i32, i32, i32
  }
  func.func @transform_7(%arg0: i32) -> (i32, i32, i32) {
    %c0_i32 = arith.constant 0 : i32
    %c0_i32_0 = arith.constant 0 : i32
    %c0_i32_1 = arith.constant 0 : i32
    %c0_i32_2 = arith.constant 0 : i32
    return %c0_i32, %c0_i32_0, %c0_i32_1 : i32, i32, i32
  }
  func.func @transform_8(%arg0: i32) -> (i32, i32) {
    %c0_i32 = arith.constant 0 : i32
    %c0_i32_0 = arith.constant 0 : i32
    %c0_i32_1 = arith.constant 0 : i32
    return %c0_i32, %c0_i32_0 : i32, i32
  }
  func.func @transform_9(%arg0: i32) -> (i32, i32) {
    %c0_i32 = arith.constant 0 : i32
    %c0_i32_0 = arith.constant 0 : i32
    %c0_i32_1 = arith.constant 0 : i32
    return %c0_i32, %c0_i32_0 : i32, i32
  }
  func.func @transform_10(%arg0: i32) -> (i32, i32) {
    %c0_i32 = arith.constant 0 : i32
    %c0_i32_0 = arith.constant 0 : i32
    %c0_i32_1 = arith.constant 0 : i32
    return %c0_i32, %c0_i32_0 : i32, i32
  }
  func.func @transform_11(%arg0: i32) -> (i32, i32) {
    %c0_i32 = arith.constant 0 : i32
    %c0_i32_0 = arith.constant 0 : i32
    %c0_i32_1 = arith.constant 0 : i32
    return %c0_i32, %c0_i32_0 : i32, i32
  }
  func.func @transform_12(%arg0: i32) -> (i32, i32) {
    %c0_i32 = arith.constant 0 : i32
    %c0_i32_0 = arith.constant 0 : i32
    %c0_i32_1 = arith.constant 0 : i32
    return %c0_i32, %c0_i32_0 : i32, i32
  }
  func.func @transform_13(%arg0: i32) -> (i32, i32) {
    %c0_i32 = arith.constant 0 : i32
    %c0_i32_0 = arith.constant 0 : i32
    %c0_i32_1 = arith.constant 0 : i32
    return %c0_i32, %c0_i32_0 : i32, i32
  }
  func.func @transform_14(%arg0: i32) -> (i32, i32) {
    %c0_i32 = arith.constant 0 : i32
    %c0_i32_0 = arith.constant 0 : i32
    %c0_i32_1 = arith.constant 0 : i32
    return %c0_i32, %c0_i32_0 : i32, i32
  }
  func.func @transform_15(%arg0: i32) -> (i32, i32) {
    %c0_i32 = arith.constant 0 : i32
    %c0_i32_0 = arith.constant 0 : i32
    %c0_i32_1 = arith.constant 0 : i32
    return %c0_i32, %c0_i32_0 : i32, i32
  }
  func.func @transform_16(%arg0: i32) -> (i32, i32) {
    %c0_i32 = arith.constant 0 : i32
    %c0_i32_0 = arith.constant 0 : i32
    %c0_i32_1 = arith.constant 0 : i32
    return %c0_i32, %c0_i32_0 : i32, i32
  }
  func.func @transform_17(%arg0: i32) -> (i32, i32) {
    %c0_i32 = arith.constant 0 : i32
    %c0_i32_0 = arith.constant 0 : i32
    return %arg0, %c0_i32 : i32, i32
  }
}

</mosaic_0001>

<bundles_post_ra>
// kernel: tpu_custom_call.1
= control target key start
LH: loop header
LB: loop body
LE: loop exit
PB: predicated region body
PF: predicated region fallthrough
CT: control target
= control target key end

     0   :  { %s6342_s0 = inlined_call_operand.vmem [shape: f32[16,32], index: 0, kind: input, shape index: {}]   ;;  %s6343_s1 = inlined_call_operand.vmem [shape: f32[16,32], index: 1, kind: input, shape index: {}]   ;;  %s6344_s2 = inlined_call_operand.vmem [shape: f32[8,8], index: 2, kind: input, shape index: {}]   ;;  %s6345_s3 = inlined_call_operand.vmem [shape: f32[16,8], index: 3, kind: input, shape index: {}]   ;;  %s6346_s4 = inlined_call_operand.vmem [shape: f32[16,32,8], index: 4, kind: input, shape index: {}]   ;;  %s6347_s5 = inlined_call_operand.vmem [shape: f32[16,1,8], index: 5, kind: input, shape index: {}]   ;;  %s6348_s6 = inlined_call_operand.vmem [shape: f32[8,32,8], index: 6, kind: input, shape index: {}]   ;;  %s6349_s7 = inlined_call_operand.vmem [shape: f32[8,1,8], index: 7, kind: input, shape index: {}]   ;;  %s6350_s8 = inlined_call_operand.vmem [shape: f32[32,32], index: 8, kind: input, shape index: {}]   ;;  %s6351_s9 = inlined_call_operand.vmem [shape: f32[1,32], index: 9, kind: input, shape index: {}]   ;;  %s6352_s10 = inlined_call_operand.vmem [shape: f32[32,32], index: 10, kind: input, shape index: {}]   ;;  %s6353_s11 = inlined_call_operand.vmem [shape: f32[1,32], index: 11, kind: input, shape index: {}]   ;;  %s6354_s12 = inlined_call_operand.vmem [shape: f32[6,32], index: 12, kind: input, shape index: {}]   ;;  %s6355_s13 = inlined_call_operand.vmem [shape: f32[32,64], index: 13, kind: input, shape index: {}]   ;;  %s6356_s14 = inlined_call_operand.vmem [shape: f32[1,64], index: 14, kind: input, shape index: {}]   ;;  %s6357_s15 = inlined_call_operand.vmem [shape: f32[64,32], index: 15, kind: input, shape index: {}]   ;;  %s6358_s16 = inlined_call_operand.vmem [shape: f32[1,32], index: 16, kind: input, shape index: {}]   ;;  %s6359_s17 = inlined_call_operand.hbm [shape: f32[16,32], index: 17, kind: output, shape index: {}]  }
   0x1   :  { %6369 = sst [smem:[#allocation12_spill]] %s6342_s0 }
   0x2   :  { %6370 = sst [smem:[#allocation13_spill]] %s6343_s1 }
   0x3   :  { %6371 = sst [smem:[#allocation14_spill]] %s6359_s17 }
   0x4   :  { %22 = vsyncpa [#allocation3], 0 }
   0x5   :  { %24 = vsyncpa [#allocation3 + $0x1], 0  ;;  %s5452_s24 = smov 0   ;;  %s5454_s25 = smov 0  }
   0x6   :  { %s5456_s26 = smov 0   ;;  %s5458_s27 = smov 0  }
   0x7 LB: > { %6372 = sst [smem:[#allocation5_spill]] %s5341_s24  ;;  %s5473_s28 = sadd.s32 4294967295, %s5353_s27   ;;  %s5353_s27 = sphi %s5458_s27, %s6388_s27   ;;  %s5349_s26 = sphi %s5456_s26, %s6390_s26   ;;  %s5345_s25 = sphi %s5454_s25, %s6392_s25   ;;  %s5341_s24 = sphi %s5452_s24, %s6391_s24  }
   0x8   : > { %6373 = sst [smem:[#allocation6_spill]] %s5349_s26  ;;  %s4369_s29 = sadd.s32 4294967294, %s5353_s27  }
   0x9   : > { %6374 = sst [smem:[#allocation7_spill]] %s5353_s27  ;;  %s5477_s0 = sadd.s32 1, %s5353_s27  }
   0xa   : > { %6375 = sst [smem:[#allocation8_spill]] %s5477_s0  ;;  %s409_s30 = sadd.s32 1, %s5349_s26 }
   0xb   : > { %s406_s18 = ssub.s32 %s5353_s27, %s5477_s0  ;;  %p419_p0 = scmp.ne.s32.totalorder %s5349_s26, %s5345_s25 }
   0xc   : > { %p407_p1 = scmp.eq.s32.totalorder %s406_s18, 0  ;;  %p420_p2 = scmp.eq.s32.totalorder %s5473_s28, 1 }
   0xd   : > { %p425_p3 = scmp.ne.s32.totalorder %s5345_s25, %s5341_s24  ;;  %p426_p4 = scmp.eq.s32.totalorder %s4369_s29, 1 }
   0xe   : > { %s5488_s19 = scalar_select %p407_p1, %s5349_s26, %s409_s30  }
   0xf   : > { %p5490_p5 = por %p420_p2, %p419_p0  ;;  %p5494_p6 = por %p426_p4, %p425_p3 }
  0x10   : > { %6376 = sst [smem:[#allocation9_spill]] %s5488_s19  ;;  %p4372_p7 = scmp.ge.s32.totalorder %s5353_s27, 1 }
  0x11   : > { %s6377_s1 = scalar_select %p5490_p5, 1, 0 }
  0x12   : > { %s6379_s20 = scalar_select %p5494_p6, 1, 0 }
  0x13   : > { %6378 = sst [smem:[#allocation10_spill]] %s6377_s1  ;;  %p507_p8 = scmp.lt.s32.totalorder %s5353_s27, 3 }
  0x14   : > { %6380 = sst [smem:[#allocation11_spill]] %s6379_s20 }
  0x15   : > { %p508_p9 = pnand %p4372_p7, %p507_p8 }
  0x16   : > { %v583_v0 = vld [vmem:[%s6346_s4] sm:$0xff] (!%p508_p9)  ;;  %v584_v1 = vld [vmem:[%s6346_s4 + $0x8] sm:$0xff] (!%p508_p9)  ;;  %v5355_v3 = vmov (!%p508_p9), 0.0|0.0   ;;  %v585_v6 = vld [vmem:[%s6346_s4 + $0x10] sm:$0xff] (!%p508_p9)  ;;  %p566_p10 = scmp.lt.s32.totalorder (!%p508_p9), %s5473_s28, 1  ;;  %vm5356_vm0 = vmmov (!%p508_p9), 0  }
  0x17   : > { %511 = sbr.rel (%p508_p9) target bundleno = 3006 (0xbbe), region = 88  ;;  %v591_v2 = vld [vmem:[%s6346_s4 + $0x40] sm:$0xff] (!%p508_p9)  ;;  %5033 = vmatprep.subr.bf16.mxu1 (!%p508_p9), %v5355_v3  ;;  %5045 = vmatprep.subr.bf16.mxu0 (!%p508_p9), %v5355_v3  ;;  %v5034_v4 = vpack.c.bf16 (!%p508_p9), %v584_v1, %v583_v0  ;;  %v592_v5 = vld [vmem:[%s6346_s4 + $0x48] sm:$0xff] (!%p508_p9)  ;;  %v586_v7 = vld [vmem:[%s6346_s4 + $0x18] sm:$0xff] (!%p508_p9)  ;;  %v5357_v11 = vmov (!%p508_p9), 0.0   ;;  %s6381_s21 = sld [smem:[#allocation12_spill]] (!%p508_p9) }
  0x18   : > { %v5046_v8 = vpack.c.bf16 (!%p508_p9), %v592_v5, %v591_v2  ;;  %v593_v9 = vld [vmem:[%s6346_s4 + $0x50] sm:$0xff] (!%p508_p9)  ;;  %v594_v10 = vld [vmem:[%s6346_s4 + $0x58] sm:$0xff] (!%p508_p9)  ;;  %4645 = vmatprep.mubr.msk.f32.mxu1 (!%p508_p9), %vm5356_vm0, %v5357_v11  ;;  %4667 = vmatprep.mubr.msk.f32.mxu0 (!%p508_p9), %vm5356_vm0, %v5357_v11  ;;  %v5037_v12 = vpack.c.bf16 (!%p508_p9), %v586_v7, %v585_v6  ;;  %v587_v14 = vld [vmem:[%s6346_s4 + $0x20] sm:$0xff] (!%p508_p9)  ;;  %vm759_vm1 = vcmask (!%p508_p9), 261120   ;;  %vm2539_vm2 = vcmask (!%p508_p9), 64512   ;;  %s5358_s17 = smov (!%p508_p9), 16  }
  0x19   : > { %5035 = vmatpush3.bf16.msra.mxu1 (!%p508_p9), %v5034_v4  ;;  %v5049_v13 = vpack.c.bf16 (!%p508_p9), %v594_v10, %v593_v9  ;;  %v588_v15 = vld [vmem:[%s6346_s4 + $0x28] sm:$0xff] (!%p508_p9)  ;;  %v599_v16 = vld [vmem:[%s6346_s4 + $0x80] sm:$0xff] (!%p508_p9)  ;;  %v589_v21 = vld [vmem:[%s6346_s4 + $0x30] sm:$0xff] (!%p508_p9)  ;;  %s5359_s1 = smov (!%p508_p9), 8   ;;  %vm3193_vm3 = vcmask (!%p508_p9), 130048   ;;  %vm3195_vm4 = vcmask (!%p508_p9), 195584  }
  0x1a   : > { %5047 = vmatpush3.bf16.msra.mxu0 (!%p508_p9), %v5046_v8  ;;  %5036 = vmatprep.subr.bf16.mxu1 (!%p508_p9), %v5355_v3  ;;  %v600_v17 = vld [vmem:[%s6346_s4 + $0x88] sm:$0xff] (!%p508_p9)  ;;  %v5040_v19 = vpack.c.bf16 (!%p508_p9), %v588_v15, %v587_v14  ;;  %v590_v22 = vld [vmem:[%s6346_s4 + $0x38] sm:$0xff] (!%p508_p9)  ;;  %v601_v23 = vld [vmem:[%s6346_s4 + $0x90] sm:$0xff] (!%p508_p9)  ;;  %vm4170_vm5 = vcmask (!%p508_p9), 523264   ;;  %s563_s30 = sand.u32 (!%p508_p9), 1, %s5345_s25   ;;  %s4458_s19 = sshll.u32 (!%p508_p9), %s5473_s28, 7 }
  0x1b   : > { %5048 = vmatprep.subr.bf16.mxu0 (!%p508_p9), %v5355_v3  ;;  %v5058_v20 = vpack.c.bf16 (!%p508_p9), %v600_v17, %v599_v16  ;;  %v602_v24 = vld [vmem:[%s6346_s4 + $0x98] sm:$0xff] (!%p508_p9)  ;;  %v5043_v25 = vpack.c.bf16 (!%p508_p9), %v590_v22, %v589_v21  ;;  %v595_v27 = vld [vmem:[%s6346_s4 + $0x60] sm:$0xff] (!%p508_p9)  ;;  %v596_v28 = vld [vmem:[%s6346_s4 + $0x68] sm:$0xff] (!%p508_p9)  ;;  %s4373_s18 = sshll.u32 (!%p508_p9), %s563_s30, 3  ;;  %s6384_s23 = sld [smem:[#allocation14_spill]] (!%p508_p9) }
  0x1c   : > { %v5061_v26 = vpack.c.bf16 (!%p508_p9), %v602_v24, %v601_v23  ;;  %v607_v29 = vld [vmem:[%s6346_s4 + $0xc0] sm:$0xff] (!%p508_p9)  ;;  %v608_v30 = vld [vmem:[%s6346_s4 + $0xc8] sm:$0xff] (!%p508_p9)  ;;  %v5052_v31 = vpack.c.bf16 (!%p508_p9), %v596_v28, %v595_v27  ;;  %v597_v33 = vld [vmem:[%s6346_s4 + $0x70] sm:$0xff] (!%p508_p9) }
  0x1d   : > { %5038 = vmatpush3.bf16.msra.mxu1 (!%p508_p9), %v5037_v12  ;;  %v5070_v32 = vpack.c.bf16 (!%p508_p9), %v608_v30, %v607_v29  ;;  %v598_v34 = vld [vmem:[%s6346_s4 + $0x78] sm:$0xff] (!%p508_p9)  ;;  %v609_v35 = vld [vmem:[%s6346_s4 + $0xd0] sm:$0xff] (!%p508_p9)  ;;  %v603_v39 = vld [vmem:[%s6346_s4 + $0xa0] sm:$0xff] (!%p508_p9) }
  0x1e   : > { %s567_s26 = scalar_select %p566_p10, %s5473_s28, 1  ;;  %5050 = vmatpush3.bf16.msra.mxu0 %v5049_v13  ;;  %5039 = vmatprep.subr.bf16.mxu1 %v5355_v3  ;;  %v610_v36 = vld [vmem:[%s6346_s4 + $0xd8] sm:$0xff]  ;;  %v5055_v37 = vpack.c.bf16 %v598_v34, %v597_v33  ;;  %v604_v40 = vld [vmem:[%s6346_s4 + $0xa8] sm:$0xff]  ;;  %v615_v41 = vld [vmem:[%s6346_s4 + $0x100] sm:$0xff] }
  0x1f   : > { %5057 = vmatprep.subr.bf16.mxu0 %v5355_v3  ;;  %v5073_v38 = vpack.c.bf16 %v610_v36, %v609_v35  ;;  %v616_v42 = vld [vmem:[%s6346_s4 + $0x108] sm:$0xff]  ;;  %v5064_v43 = vpack.c.bf16 %v604_v40, %v603_v39  ;;  %v605_v44 = vld [vmem:[%s6346_s4 + $0xb0] sm:$0xff]  ;;  %v606_v45 = vld [vmem:[%s6346_s4 + $0xb8] sm:$0xff]  ;;  %s5361_s28 = smov [#allocation2]  }
  0x20   : > { %s5540_s22 = sshll.u32 %s567_s26, 3  ;;  %v5082_v46 = vpack.c.bf16 %v616_v42, %v615_v41  ;;  %v617_v47 = vld [vmem:[%s6346_s4 + $0x110] sm:$0xff]  ;;  %v618_v48 = vld [vmem:[%s6346_s4 + $0x118] sm:$0xff]  ;;  %v5067_v49 = vpack.c.bf16 %v606_v45, %v605_v44  ;;  %v611_v50 = vld [vmem:[%s6346_s4 + $0xe0] sm:$0xff]  ;;  %s6382_s26 = sld [smem:[#allocation13_spill]] }
  0x21   : > { %s5552_s27 = scalar_lea.vmem %s6381_s21, %s5540_s22  ;;  %v612_v51 = vld [vmem:[%s6346_s4 + $0xe8] sm:$0xff]  ;;  %v5085_v52 = vpack.c.bf16 %v618_v48, %v617_v47  ;;  %v623_v53 = vld [vmem:[%s6346_s4 + $0x140] sm:$0xff]  ;;  %v613_v56 = vld [vmem:[%s6346_s4 + $0xf0] sm:$0xff]  ;;  %s577_s29 = scalar_lea.vmem %s6345_s3, %s5540_s22 }
  0x22   : > { %v5555_v18 = vld [vmem:[%s5552_s27] sm:$0xff]  ;;  %v624_v54 = vld [vmem:[%s6346_s4 + $0x148] sm:$0xff]  ;;  %v5076_v55 = vpack.c.bf16 %v612_v51, %v611_v50  ;;  %v614_v57 = vld [vmem:[%s6346_s4 + $0xf8] sm:$0xff]  ;;  %s565_s21 = scalar_lea.vmem [#allocation2], %s4373_s18  ;;  %s6299_s24 = scalar_lea.hbm %s6384_s23, %s4458_s19 }
  0x23   : > { %4646 = vmatmul.mubr.msk.f32.vlgmr.msra.gmra.mrb[0].mxu1 %vm759_vm1, %v5555_v18  ;;  %4668 = vmatmul.mubr.msk.f32.vlgmr.msra.gmra.mrb[0].mxu0 %vm759_vm1, %v5555_v18  ;;  %v5094_v58 = vpack.c.bf16 %v624_v54, %v623_v53  ;;  %v625_v59 = vld [vmem:[%s6346_s4 + $0x150] sm:$0xff]  ;;  %v626_v60 = vld [vmem:[%s6346_s4 + $0x158] sm:$0xff]  ;;  %v5079_v61 = vpack.c.bf16 %v614_v57, %v613_v56  ;;  %v619_v62 = vld [vmem:[%s6346_s4 + $0x120] sm:$0xff] }
  0x24   : > { %5041 = vmatpush3.bf16.msra.mxu1 %v5040_v19  ;;  %5059 = vmatpush3.bf16.msra.mxu0 %v5058_v20  ;;  %v620_v63 = vld [vmem:[%s6346_s4 + $0x128] sm:$0xff]  ;;  %v5097_v0 = vpack.c.bf16 %v626_v60, %v625_v59  ;;  %v631_v1 = vld [vmem:[%s6346_s4 + $0x180] sm:$0xff]  ;;  %v621_v5 = vld [vmem:[%s6346_s4 + $0x130] sm:$0xff] }
  0x25   : > { %5042 = vmatprep.subr.bf16.mxu1 %v5355_v3  ;;  %5060 = vmatprep.subr.bf16.mxu0 %v5355_v3  ;;  %v632_v2 = vld [vmem:[%s6346_s4 + $0x188] sm:$0xff]  ;;  %v5088_v4 = vpack.c.bf16 %v620_v63, %v619_v62  ;;  %v622_v6 = vld [vmem:[%s6346_s4 + $0x138] sm:$0xff]  ;;  %v633_v8 = vld [vmem:[%s6346_s4 + $0x190] sm:$0xff] }
  0x26   : > { %4656 = vmatprep.mubr.msk.f32.mxu1 %vm5356_vm0, %v5357_v11  ;;  %4689 = vmatprep.mubr.msk.f32.mxu0 %vm5356_vm0, %v5357_v11  ;;  %v5106_v7 = vpack.c.bf16 %v632_v2, %v631_v1  ;;  %v634_v9 = vld [vmem:[%s6346_s4 + $0x198] sm:$0xff]  ;;  %v5091_v10 = vpack.c.bf16 %v622_v6, %v621_v5  ;;  %v627_v12 = vld [vmem:[%s6346_s4 + $0x160] sm:$0xff]  ;;  %v628_v13 = vld [vmem:[%s6346_s4 + $0x168] sm:$0xff]  ;;  %s573_s0 = scalar_lea.vmem %s6382_s26, %s5540_s22  ;;  %s4286_s26 = sshll.u32 %s565_s21, 4  ;;  %s6301_s26 = int_to_ptr.vmem [resolvable:$true] %s4286_s26 }
  0x27   : > { %v5109_v14 = vpack.c.bf16 %v634_v9, %v633_v8  ;;  %v639_v15 = vld [vmem:[%s6346_s4 + $0x1c0] sm:$0xff]  ;;  %v640_v16 = vld [vmem:[%s6346_s4 + $0x1c8] sm:$0xff]  ;;  %v5100_v17 = vpack.c.bf16 %v628_v13, %v627_v12  ;;  %v629_v19 = vld [vmem:[%s6346_s4 + $0x170] sm:$0xff] }
  0x28   : > { %5044 = vmatpush3.bf16.msra.mxu1 %v5043_v25  ;;  %5062 = vmatpush3.bf16.msra.mxu0 %v5061_v26  ;;  %v630_v20 = vld [vmem:[%s6346_s4 + $0x178] sm:$0xff]  ;;  %v5118_v21 = vpack.c.bf16 %v640_v16, %v639_v15  ;;  %v641_v22 = vld [vmem:[%s6346_s4 + $0x1d0] sm:$0xff]  ;;  %v635_v25 = vld [vmem:[%s6346_s4 + $0x1a0] sm:$0xff] }
  0x29   : > { %5051 = vmatprep.subr.bf16.mxu1 %v5355_v3  ;;  %5069 = vmatprep.subr.bf16.mxu0 %v5355_v3  ;;  %v642_v23 = vld [vmem:[%s6346_s4 + $0x1d8] sm:$0xff]  ;;  %v5103_v24 = vpack.c.bf16 %v630_v20, %v629_v19  ;;  %v636_v26 = vld [vmem:[%s6346_s4 + $0x1a8] sm:$0xff]  ;;  %v1883_v28 = vld [vmem:[%s6348_s6] sm:$0xff] }
  0x2a   : > { %v5121_v27 = vpack.c.bf16 %v642_v23, %v641_v22  ;;  %v1884_v29 = vld [vmem:[%s6348_s6 + $0x8] sm:$0xff]  ;;  %v5112_v30 = vpack.c.bf16 %v636_v26, %v635_v25  ;;  %v1885_v34 = vld [vmem:[%s6348_s6 + $0x10] sm:$0xff]  ;;  %v1886_v35 = vld [vmem:[%s6348_s6 + $0x18] sm:$0xff] }
  0x2b   : > { %4657 = vmatmul.mubr.msk.f32.vlgmr.msra.gmra.mrb[2].mxu1 %vm759_vm1, %v5555_v18  ;;  %4690 = vmatmul.mubr.msk.f32.vlgmr.msra.gmra.mrb[2].mxu0 %vm759_vm1, %v5555_v18  ;;  %v5130_v33 = vpack.c.bf16 %v1884_v29, %v1883_v28  ;;  %v5133_v39 = vpack.c.bf16 %v1886_v35, %v1885_v34  ;;  %v1891_v40 = vld [vmem:[%s6348_s6 + $0x40] sm:$0xff]  ;;  %v1892_v41 = vld [vmem:[%s6348_s6 + $0x48] sm:$0xff]  ;;  %v646_v44 = vld [vmem:[%s6346_s4 + $0x1f8] sm:$0xff] }
  0x2c   : > { %5053 = vmatpush3.bf16.msra.mxu1 %v5052_v31  ;;  %5071 = vmatpush3.bf16.msra.mxu0 %v5070_v32  ;;  %v637_v31 = vld [vmem:[%s6346_s4 + $0x1b0] sm:$0xff]  ;;  %v638_v32 = vld [vmem:[%s6346_s4 + $0x1b8] sm:$0xff]  ;;  %v5820_v45 = vld [vmem:[%s573_s0] sm:$0xff]  ;;  %s5360_s0 = smov 24  }
  0x2d   : > { %5054 = vmatprep.subr.bf16.mxu1 %v5355_v3  ;;  %5072 = vmatprep.subr.bf16.mxu0 %v5355_v3  ;;  %v5115_v36 = vpack.c.bf16 %v638_v32, %v637_v31  ;;  %v1893_v47 = vld [vmem:[%s6348_s6 + $0x50] sm:$0xff]  ;;  %v1894_v48 = vld [vmem:[%s6348_s6 + $0x58] sm:$0xff]  ;;  %v1887_v50 = vld [vmem:[%s6348_s6 + $0x20] sm:$0xff] }
  0x2e   : > { %4678 = vmatprep.mubr.msk.f32.mxu1 %vm5356_vm0, %v5357_v11  ;;  %4711 = vmatprep.mubr.msk.f32.mxu0 %vm5356_vm0, %v5357_v11  ;;  %v1888_v51 = vld [vmem:[%s6348_s6 + $0x28] sm:$0xff]  ;;  %v1899_v53 = vld [vmem:[%s6348_s6 + $0x80] sm:$0xff]  ;;  %v1889_v56 = vld [vmem:[%s6348_s6 + $0x30] sm:$0xff] }
  0x2f   : > { %v1900_v54 = vld [vmem:[%s6348_s6 + $0x88] sm:$0xff]  ;;  %v1890_v57 = vld [vmem:[%s6348_s6 + $0x38] sm:$0xff]  ;;  %v1901_v59 = vld [vmem:[%s6348_s6 + $0x90] sm:$0xff] }
  0x30   : > { %5056 = vmatpush3.bf16.msra.mxu1 %v5055_v37  ;;  %5074 = vmatpush3.bf16.msra.mxu0 %v5073_v38  ;;  %v643_v37 = vld [vmem:[%s6346_s4 + $0x1e0] sm:$0xff]  ;;  %v644_v38 = vld [vmem:[%s6346_s4 + $0x1e8] sm:$0xff]  ;;  %v1902_v60 = vld [vmem:[%s6348_s6 + $0x98] sm:$0xff] }
  0x31   : > { %5063 = vmatprep.subr.bf16.mxu1 %v5355_v3  ;;  %5081 = vmatprep.subr.bf16.mxu0 %v5355_v3  ;;  %v5124_v42 = vpack.c.bf16 %v644_v38, %v643_v37  ;;  %v1896_v62 = vld [vmem:[%s6348_s6 + $0x68] sm:$0xff]  ;;  %v5157_v63 = vpack.c.bf16 %v1902_v60, %v1901_v59  ;;  %v1897_v5 = vld [vmem:[%s6348_s6 + $0x70] sm:$0xff]  ;;  %v1898_v6 = vld [vmem:[%s6348_s6 + $0x78] sm:$0xff] }
  0x32   : > { %v1908_v1 = vld [vmem:[%s6348_s6 + $0xc8] sm:$0xff]  ;;  %v5151_v8 = vpack.c.bf16 %v1898_v6, %v1897_v5  ;;  %v1910_v9 = vld [vmem:[%s6348_s6 + $0xd8] sm:$0xff]  ;;  %v1903_v12 = vld [vmem:[%s6348_s6 + $0xa0] sm:$0xff] }
  0x33   : > { %4679 = vmatmul.mubr.msk.f32.vlgmr.msra.gmra.mrb[4].mxu1 %vm759_vm1, %v5555_v18  ;;  %4712 = vmatmul.mubr.msk.f32.vlgmr.msra.gmra.mrb[4].mxu0 %vm759_vm1, %v5555_v18  ;;  %v1904_v13 = vld [vmem:[%s6348_s6 + $0xa8] sm:$0xff]  ;;  %v1905_v15 = vld [vmem:[%s6348_s6 + $0xb0] sm:$0xff]  ;;  %v1906_v16 = vld [vmem:[%s6348_s6 + $0xb8] sm:$0xff] }
  0x34   : > { %5065 = vmatpush3.bf16.msra.mxu1 %v5064_v43  ;;  %4700 = vmatprep.mubr.msk.f32.mxu1 %vm5356_vm0, %v5357_v11  ;;  %v645_v43 = vld [vmem:[%s6346_s4 + $0x1f0] sm:$0xff]  ;;  %v1911_v19 = vld [vmem:[%s6348_s6 + $0xe0] sm:$0xff]  ;;  %v1912_v20 = vld [vmem:[%s6348_s6 + $0xe8] sm:$0xff] }
  0x35   : > { %5066 = vmatprep.subr.bf16.mxu1 %v5355_v3  ;;  %5083 = vmatpush3.bf16.msra.mxu0 %v5082_v46  ;;  %v5142_v46 = vpack.c.bf16 %v1892_v41, %v1891_v40  ;;  %v1913_v22 = vld [vmem:[%s6348_s6 + $0xf0] sm:$0xff]  ;;  %v1914_v23 = vld [vmem:[%s6348_s6 + $0xf8] sm:$0xff]  ;;  %v4381_v29 = vld [vmem:[%s6347_s5 + $0x4] ss:$0 sm:$0xff] }
  0x36   : > { %4733 = vmatprep.mubr.msk.f32.mxu0 %vm5356_vm0, %v5357_v11  ;;  %5084 = vmatprep.subr.bf16.mxu0 %v5355_v3  ;;  %v4383_v37 = vld [vmem:[%s6347_s5 + $0x6] ss:$0 sm:$0xff]  ;;  %v4379_v41 = vld [vmem:[%s6347_s5 + $0x2] ss:$0 sm:$0xff] }
  0x38   : > { %5068 = vmatpush3.bf16.msra.mxu1 %v5067_v49  ;;  %v5127_v49 = vpack.c.bf16 %v646_v44, %v645_v43 }
  0x39   : > { %5075 = vmatprep.subr.bf16.mxu1 %v5355_v3  ;;  %5086 = vmatpush3.bf16.msra.mxu0 %v5085_v52  ;;  %v5145_v52 = vpack.c.bf16 %v1894_v48, %v1893_v47  ;;  %v4385_v47 = vld [vmem:[%s6347_s5 + $0x8] ss:$0 sm:$0xff]  ;;  %v4378_v48 = vld [vmem:[%s6347_s5 + $0x1] ss:$0 sm:$0xff] }
  0x3a   : > { %5093 = vmatprep.subr.bf16.mxu0 %v5355_v3 }
  0x3b   : > { %4701 = vmatmul.mubr.msk.f32.vlgmr.msra.gmra.mrb[6].mxu1 %vm759_vm1, %v5555_v18 }
  0x3c   : > { %5077 = vmatpush3.bf16.msra.mxu1 %v5076_v55  ;;  %4722 = vmatprep.mubr.msk.f32.mxu1 %vm5356_vm0, %v5357_v11  ;;  %v5136_v55 = vpack.c.bf16 %v1888_v51, %v1887_v50 }
  0x3d   : > { %5078 = vmatprep.subr.bf16.mxu1 %v5355_v3  ;;  %4734 = vmatmul.mubr.msk.f32.vlgmr.msra.gmra.mrb[6].mxu0 %vm759_vm1, %v5555_v18 }
  0x3e   : > { %5095 = vmatpush3.bf16.msra.mxu0 %v5094_v58  ;;  %4755 = vmatprep.mubr.msk.f32.mxu0 %vm5356_vm0, %v5357_v11  ;;  %v5154_v58 = vpack.c.bf16 %v1900_v54, %v1899_v53 }
  0x3f   : > { %5096 = vmatprep.subr.bf16.mxu0 %v5355_v3 }
  0x40   : > { %5080 = vmatpush3.bf16.msra.mxu1 %v5079_v61  ;;  %v5139_v61 = vpack.c.bf16 %v1890_v57, %v1889_v56  ;;  %v4380_v57 = vld [vmem:[%s6347_s5 + $0x3] ss:$0 sm:$0xff] }
  0x41   : > { %5087 = vmatprep.subr.bf16.mxu1 %v5355_v3 }
  0x42   : > { %5098 = vmatpush3.bf16.msra.mxu0 %v5097_v0  ;;  %v1907_v0 = vld [vmem:[%s6348_s6 + $0xc0] sm:$0xff] }
  0x43   : > { %4723 = vmatmul.mubr.msk.f32.vlgmr.msra.gmra.mrb[8].mxu1 %vm759_vm1, %v5555_v18  ;;  %5105 = vmatprep.subr.bf16.mxu0 %v5355_v3 }
  0x44   : > { %5089 = vmatpush3.bf16.msra.mxu1 %v5088_v4  ;;  %4744 = vmatprep.mubr.msk.f32.mxu1 %vm5356_vm0, %v5357_v11  ;;  %v5166_v4 = vpack.c.bf16 %v1908_v1, %v1907_v0 }
  0x45   : > { %4756 = vmatmul.mubr.msk.f32.vlgmr.msra.gmra.mrb[8].mxu0 %vm759_vm1, %v5555_v18  ;;  %5090 = vmatprep.subr.bf16.mxu1 %v5355_v3 }
  0x46   : > { %5107 = vmatpush3.bf16.msra.mxu0 %v5106_v7  ;;  %4777 = vmatprep.mubr.msk.f32.mxu0 %vm5356_vm0, %v5357_v11  ;;  %v1909_v7 = vld [vmem:[%s6348_s6 + $0xd0] sm:$0xff] }
  0x47   : > { %5108 = vmatprep.subr.bf16.mxu0 %v5355_v3 }
  0x48   : > { %5092 = vmatpush3.bf16.msra.mxu1 %v5091_v10  ;;  %v5169_v10 = vpack.c.bf16 %v1910_v9, %v1909_v7 }
  0x49   : > { %5099 = vmatprep.subr.bf16.mxu1 %v5355_v3 }
  0x4a   : > { %5110 = vmatpush3.bf16.msra.mxu0 %v5109_v14  ;;  %v5160_v14 = vpack.c.bf16 %v1904_v13, %v1903_v12 }
  0x4b   : > { %5117 = vmatprep.subr.bf16.mxu0 %v5355_v3  ;;  %4745 = vmatmul.mubr.msk.f32.vlgmr.msra.gmra.mrb[10].mxu1 %vm759_vm1, %v5555_v18 }
  0x4c   : > { %5101 = vmatpush3.bf16.msra.mxu1 %v5100_v17  ;;  %4766 = vmatprep.mubr.msk.f32.mxu1 %vm5356_vm0, %v5357_v11  ;;  %v5163_v17 = vpack.c.bf16 %v1906_v16, %v1905_v15 }
  0x4d   : > { %4778 = vmatmul.mubr.msk.f32.vlgmr.msra.gmra.mrb[10].mxu0 %vm759_vm1, %v5555_v18  ;;  %5102 = vmatprep.subr.bf16.mxu1 %v5355_v3 }
  0x4e   : > { %5119 = vmatpush3.bf16.msra.mxu0 %v5118_v21  ;;  %4799 = vmatprep.mubr.msk.f32.mxu0 %vm5356_vm0, %v5357_v11  ;;  %v5172_v21 = vpack.c.bf16 %v1912_v20, %v1911_v19 }
  0x4f   : > { %5120 = vmatprep.subr.bf16.mxu0 %v5355_v3 }
  0x50   : > { %5104 = vmatpush3.bf16.msra.mxu1 %v5103_v24  ;;  %v5175_v24 = vpack.c.bf16 %v1914_v23, %v1913_v22 }
  0x51   : > { %5111 = vmatprep.subr.bf16.mxu1 %v5355_v3 }
  0x52   : > { %5122 = vmatpush3.bf16.msra.mxu0 %v5121_v27 }
  0x53   : > { %5129 = vmatprep.subr.bf16.mxu0 %v5355_v3  ;;  %4767 = vmatmul.mubr.msk.f32.vlgmr.msra.gmra.mrb[12].mxu1 %vm759_vm1, %v5555_v18 }
  0x54   : > { %5113 = vmatpush3.bf16.msra.mxu1 %v5112_v30  ;;  %4788 = vmatprep.mubr.msk.f32.mxu1 %vm5356_vm0, %v5357_v11 }
  0x55   : > { %4800 = vmatmul.mubr.msk.f32.vlgmr.msra.gmra.mrb[12].mxu0 %vm759_vm1, %v5555_v18  ;;  %5114 = vmatprep.subr.bf16.mxu1 %v5355_v3 }
  0x56   : > { %5131 = vmatpush3.bf16.msra.mxu0 %v5130_v33  ;;  %4821 = vmatprep.mubr.msk.f32.mxu0 %vm5356_vm0, %v5357_v11  ;;  %v4377_v33 = vld [vmem:[%s6347_s5] ss:$0 sm:$0xff] }
  0x57   : > { %5132 = vmatprep.subr.bf16.mxu0 %v5355_v3 }
  0x58   : > { %5116 = vmatpush3.bf16.msra.mxu1 %v5115_v36 }
  0x59   : > { %5123 = vmatprep.subr.bf16.mxu1 %v5355_v3 }
  0x5a   : > { %5134 = vmatpush3.bf16.msra.mxu0 %v5133_v39 }
  0x5b   : > { %5141 = vmatprep.subr.bf16.mxu0 %v5355_v3  ;;  %4789 = vmatmul.mubr.msk.f32.vlgmr.msra.gmra.mrb[14].mxu1 %vm759_vm1, %v5555_v18 }
  0x5c   : > { %5125 = vmatpush3.bf16.msra.mxu1 %v5124_v42  ;;  %4810 = vmatprep.mubr.msk.f32.mxu1 %vm5356_vm0, %v5357_v11 }
  0x5d   : > { %4822 = vmatmul.mubr.msk.f32.vlgmr.msra.gmra.mrb[14].mxu0 %vm759_vm1, %v5820_v45  ;;  %5126 = vmatprep.subr.bf16.mxu1 %v5355_v3 }
  0x5e   : > { %5143 = vmatpush3.bf16.msra.mxu0 %v5142_v46  ;;  %4843 = vmatprep.mubr.msk.f32.mxu0 %vm5356_vm0, %v5357_v11 }
  0x5f   : > { %5144 = vmatprep.subr.bf16.mxu0 %v5355_v3 }
  0x60   : > { %5128 = vmatpush3.bf16.msra.mxu1 %v5127_v49 }
  0x61   : > { %5135 = vmatprep.subr.bf16.mxu1 %v5355_v3 }
  0x62   : > { %5146 = vmatpush3.bf16.msra.mxu0 %v5145_v52 }
  0x63   : > { %5153 = vmatprep.subr.bf16.mxu0 %v5355_v3  ;;  %4811 = vmatmul.mubr.msk.f32.vlgmr.msra.gmra.mrb[16].mxu1 %vm759_vm1, %v5555_v18  ;;  %v1895_v18 = vld [vmem:[%s6348_s6 + $0x60] sm:$0xff] }
  0x64   : > { %5137 = vmatpush3.bf16.msra.mxu1 %v5136_v55  ;;  %4832 = vmatprep.mubr.msk.f32.mxu1 %vm5356_vm0, %v5357_v11  ;;  %v5148_v2 = vpack.c.bf16 %v1896_v62, %v1895_v18  ;;  %v4384_v55 = vld [vmem:[%s6347_s5 + $0x7] ss:$0 sm:$0xff]  ;;  %v4386_v62 = vld [vmem:[%s6347_s5 + $0x9] ss:$0 sm:$0xff] }
  0x65   : > { %4844 = vmatmul.mubr.msk.f32.vlgmr.msra.gmra.mrb[16].mxu0 %vm759_vm1, %v5820_v45  ;;  %5138 = vmatprep.subr.bf16.mxu1 %v5355_v3 }
  0x66   : > { %5155 = vmatpush3.bf16.msra.mxu0 %v5154_v58  ;;  %4865 = vmatprep.mubr.msk.f32.mxu0 %vm5356_vm0, %v5357_v11 }
  0x67   : > { %5156 = vmatprep.subr.bf16.mxu0 %v5355_v3 }
  0x68   : > { %5140 = vmatpush3.bf16.msra.mxu1 %v5139_v61 }
  0x69   : > { %5147 = vmatprep.subr.bf16.mxu1 %v5355_v3 }
  0x6a   : > { %5158 = vmatpush3.bf16.msra.mxu0 %v5157_v63 }
  0x6b   : > { %5165 = vmatprep.subr.bf16.mxu0 %v5355_v3  ;;  %4833 = vmatmul.mubr.msk.f32.vlgmr.msra.gmra.mrb[18].mxu1 %vm759_vm1, %v5820_v45 }
  0x6c   : > { %5149 = vmatpush3.bf16.msra.mxu1 %v5148_v2  ;;  %4854 = vmatprep.mubr.msk.f32.mxu1 %vm5356_vm0, %v5357_v11 }
  0x6d   : > { %4866 = vmatmul.mubr.msk.f32.vlgmr.msra.gmra.mrb[18].mxu0 %vm759_vm1, %v5820_v45  ;;  %5150 = vmatprep.subr.bf16.mxu1 %v5355_v3 }
  0x6e   : > { %5167 = vmatpush3.bf16.msra.mxu0 %v5166_v4  ;;  %4887 = vmatprep.mubr.msk.f32.mxu0 %vm5356_vm0, %v5357_v11 }
  0x6f   : > { %5168 = vmatprep.subr.bf16.mxu0 %v5355_v3 }
  0x70   : > { %5152 = vmatpush3.bf16.msra.mxu1 %v5151_v8 }
  0x71   : > { %5159 = vmatprep.subr.bf16.mxu1 %v5355_v3 }
  0x72   : > { %5170 = vmatpush3.bf16.msra.mxu0 %v5169_v10 }
  0x73   : > { %4901 = vmatprep.subr.mxu0 %v5357_v11  ;;  %4855 = vmatmul.mubr.msk.f32.vlgmr.msra.gmra.mrb[20].mxu1 %vm759_vm1, %v5820_v45 }
  0x74   : > { %5161 = vmatpush3.bf16.msra.mxu1 %v5160_v14  ;;  %4876 = vmatprep.mubr.msk.f32.mxu1 %vm5356_vm0, %v5357_v11 }
  0x75   : > { %4888 = vmatmul.mubr.msk.f32.vlgmr.msra.gmra.mrb[20].mxu0 %vm759_vm1, %v5820_v45  ;;  %5162 = vmatprep.subr.bf16.mxu1 %v5355_v3 }
  0x76   : > { %4903 = vmatprep.mubr.msk.f32.mxu0 %vm5356_vm0, %v5357_v11 }
  0x78   : > { %5164 = vmatpush3.bf16.msra.mxu1 %v5163_v17 }
  0x79   : > { %5171 = vmatprep.subr.bf16.mxu1 %v5355_v3 }
  0x7b   : > { %4877 = vmatmul.mubr.msk.f32.vlgmr.msra.gmra.mrb[22].mxu1 %vm759_vm1, %v5820_v45 }
  0x7c   : > { %5173 = vmatpush3.bf16.msra.mxu1 %v5172_v21  ;;  %4898 = vmatprep.mubr.msk.f32.mxu1 %vm5356_vm0, %v5357_v11 }
  0x7d   : > { %5174 = vmatprep.subr.bf16.mxu1 %v5355_v3 }
  0x80   : > { %5176 = vmatpush3.bf16.msra.mxu1 %v5175_v24 }
  0x81   : > { %4906 = vmatprep.subr.mxu1 %v5357_v11 }
  0x83   : > { %4899 = vmatmul.mubr.msk.f32.vlgmr.msra.gmra.mrb[24].mxu1 %vm759_vm1, %v5820_v45  ;;  %v4382_v45 = vld [vmem:[%s6347_s5 + $0x5] ss:$0 sm:$0xff] }
  0x84   : > { %4908 = vmatprep.mubr.msk.f32.mxu1 %vm5356_vm0, %v5357_v11 }
  0xf6   : > { %v829_v25 = vpop.f32.mrb[0].mxu1  ;;  %v969_v27 = vpop.f32.mrb[0].mxu0 }
  0xf7   : > { %v4647_v26 = vpop.f32.mrb[1].mxu1  ;;  %v4669_v28 = vpop.f32.mrb[1].mxu0  ;;  %v830_v36 = vadd.f32 %v4377_v33, %v829_v25  ;;  %v970_v44 = vadd.f32 %v4379_v41, %v969_v27 }
  0xfe   : > { %v899_v30 = vpop.f32.mrb[2].mxu1  ;;  %v1109_v31 = vpop.f32.mrb[2].mxu0 }
  0xff   : > { %v4658_v32 = vpop.f32.mrb[3].mxu1  ;;  %v1110_v34 = vadd.f32 %v4381_v29, %v1109_v31  ;;  %v4691_v35 = vpop.f32.mrb[3].mxu0  ;;  %v900_v54 = vadd.f32 %v4378_v48, %v899_v30  ;;  %v580_v31 = vld [vmem:[%s6344_s2] sm:$0xff] }
 0x101   : > { %4902 = vmatpush3.xpose.msk.msra.mxu0 %vm2539_vm2, %v1110_v34 }
 0x102   : > { %4911 = vmatprep.subr.mxu0 %v5357_v11 }
 0x104   : > { %4904 = vmatmul.mubr.msk.f32.vlgmr.msra.gmra.mrb[22].mxu0 %vm2539_vm2, %v830_v36 }
 0x105   : > { %4913 = vmatprep.mubr.msk.f32.mxu0 %vm5356_vm0, %v5357_v11 }
 0x106   : > { %v1039_v38 = vpop.f32.mrb[4].mxu1  ;;  %v1249_v39 = vpop.f32.mrb[4].mxu0 }
 0x107   : > { %v4680_v40 = vpop.f32.mrb[5].mxu1  ;;  %v1250_v42 = vadd.f32 %v4383_v37, %v1249_v39  ;;  %v4713_v43 = vpop.f32.mrb[5].mxu0  ;;  %v1040_v18 = vadd.f32 %v4380_v57, %v1039_v38 }
 0x109   : > { %4912 = vmatpush3.xpose.msk.msra.mxu0 %vm2539_vm2, %v1250_v42 }
 0x10a   : > { %4921 = vmatprep.subr.mxu0 %v5357_v11 }
 0x10c   : > { %4914 = vmatmul.mubr.msk.f32.vlgmr.msra.gmra.mrb[24].mxu0 %vm2539_vm2, %v970_v44 }
 0x10d   : > { %4923 = vmatprep.mubr.msk.f32.mxu0 %vm5356_vm0, %v5357_v11 }
 0x10e   : > { %v1179_v46 = vpop.f32.mrb[6].mxu1 }
 0x10f   : > { %v1180_v49 = vadd.f32 %v4382_v45, %v1179_v46  ;;  %v4702_v50 = vpop.f32.mrb[7].mxu1 }
 0x110   : > { %v1389_v51 = vpop.f32.mrb[6].mxu0 }
 0x111   : > { %4907 = vmatpush3.xpose.msk.msra.mxu1 %vm2539_vm2, %v1180_v49  ;;  %v1390_v52 = vadd.f32 %v4385_v47, %v1389_v51  ;;  %v4735_v53 = vpop.f32.mrb[7].mxu0 }
 0x112   : > { %4916 = vmatprep.subr.mxu1 %v5357_v11 }
 0x113   : > { %4922 = vmatpush3.msra.mxu0 %v1390_v52 }
 0x114   : > { %4909 = vmatmul.mubr.msk.f32.vlgmr.msra.gmra.mrb[26].mxu1 %vm2539_vm2, %v900_v54  ;;  %4931 = vmatprep.subr.mxu0 %v5357_v11 }
 0x115   : > { %4918 = vmatprep.mubr.msk.f32.mxu1 %vm5356_vm0, %v5357_v11 }
 0x116   : > { %v1319_v56 = vpop.f32.mrb[8].mxu1 }
 0x117   : > { %v1320_v58 = vadd.f32 %v4384_v55, %v1319_v56  ;;  %v4724_v59 = vpop.f32.mrb[9].mxu1 }
 0x118   : > { %v6000_v60 = vpop.f32.mrb[8].mxu0 }
 0x119   : > { %4917 = vmatpush3.xpose.msk.msra.mxu1 %vm2539_vm2, %v1320_v58  ;;  %v4757_v61 = vpop.f32.mrb[9].mxu0 }
 0x11a   : > { %4926 = vmatprep.subr.mxu1 %v5357_v11 }
 0x11c   : > { %4919 = vmatmul.mubr.msk.f32.vlgmr.msra.gmra.mrb[28].mxu1 %vm2539_vm2, %v1040_v18 }
 0x11d   : > { %4928 = vmatprep.mubr.msk.f32.mxu1 %vm5356_vm0, %v5357_v11 }
 0x11e   : > { %v1459_v63 = vpop.f32.mrb[10].mxu1 }
 0x11f   : > { %v1460_v0 = vadd.f32 %v4386_v62, %v1459_v63  ;;  %v4746_v1 = vpop.f32.mrb[11].mxu1 }
 0x120   : > { %v6010_v2 = vpop.f32.mrb[10].mxu0 }
 0x121   : > { %4927 = vmatpush3.msra.mxu1 %v1460_v0  ;;  %v4779_v4 = vpop.f32.mrb[11].mxu0 }
 0x122   : > { %4936 = vmatprep.subr.mxu1 %v5357_v11 }
 0x126   : > { %v6013_v5 = vpop.f32.mrb[12].mxu1 }
 0x127   : > { %v4768_v6 = vpop.f32.mrb[13].mxu1 }
 0x128   : > { %v6015_v7 = vpop.f32.mrb[12].mxu0 }
 0x129   : > { %v4801_v8 = vpop.f32.mrb[13].mxu0 }
 0x12e   : > { %v6017_v9 = vpop.f32.mrb[14].mxu1 }
 0x12f   : > { %v4790_v10 = vpop.f32.mrb[15].mxu1 }
 0x130   : > { %v6019_v12 = vpop.f32.mrb[14].mxu0 }
 0x131   : > { %v4823_v13 = vpop.f32.mrb[15].mxu0 }
 0x132   : > { %v4387_v13 = vld [vmem:[%s6347_s5 + $0xa] ss:$0 sm:$0xff] }
 0x136   : > { %v6021_v14 = vpop.f32.mrb[16].mxu1 }
 0x137   : > { %v4812_v15 = vpop.f32.mrb[17].mxu1 }
 0x138   : > { %v6023_v16 = vpop.f32.mrb[16].mxu0 }
 0x139   : > { %v4845_v17 = vpop.f32.mrb[17].mxu0 }
 0x13e   : > { %v6025_v19 = vpop.f32.mrb[18].mxu1 }
 0x13f   : > { %v4834_v20 = vpop.f32.mrb[19].mxu1 }
 0x140   : > { %v6027_v21 = vpop.f32.mrb[18].mxu0  ;;  %v1530_v20 = vadd.f32 %v4387_v13, %v6000_v60  ;;  %v4388_v60 = vld [vmem:[%s6347_s5 + $0xb] ss:$0 sm:$0xff] }
 0x141   : > { %v4867_v22 = vpop.f32.mrb[19].mxu0 }
 0x146   : > { %v6029_v23 = vpop.f32.mrb[20].mxu1 }
 0x147   : > { %v4856_v24 = vpop.f32.mrb[21].mxu1 }
 0x148   : > { %v6031_v25 = vpop.f32.mrb[20].mxu0 }
 0x149   : > { %v4889_v26 = vpop.f32.mrb[21].mxu0 }
 0x14e   : > { %v6033_v27 = vpop.f32.mrb[22].mxu1 }
 0x14f   : > { %v4878_v28 = vpop.f32.mrb[23].mxu1 }
 0x156   : > { %v6035_v29 = vpop.f32.mrb[24].mxu1 }
 0x157   : > { %v4900_v30 = vpop.f32.mrb[25].mxu1 }
 0x1d7   : > { %v2612_v32 = vpop.f32.mrb[22].mxu0 }
 0x1d8   : > { %v2613_v33 = vadd.f32 %v2612_v32, %v580_v31  ;;  %v4905_v34 = vpop.f32.mrb[23].mxu0  ;;  %v1600_v32 = vadd.f32 %v4388_v60, %v6013_v5 }
 0x1da   : > { %v2844_v35 = vsel %vm2539_vm2, %v2613_v33, -inf }
 0x1db   : > { %2845 = vmax.xlane.f32.xlu0 %v2844_v35 }
 0x1df   : > { %v2764_v36 = vpop.f32.mrb[24].mxu0 }
 0x1e0   : > { %v2765_v37 = vadd.f32 %v2764_v36, %v580_v31  ;;  %v4915_v38 = vpop.f32.mrb[25].mxu0  ;;  %v4389_v36 = vld [vmem:[%s6347_s5 + $0xc] ss:$0 sm:$0xff] }
 0x1e1   : > { %v1670_v38 = vadd.f32 %v4389_v36, %v6010_v2 }
 0x1e2   : > { %v2850_v39 = vsel %vm2539_vm2, %v2765_v37, -inf }
 0x1e3   : > { %2851 = vmax.xlane.f32.xlu1 %v2850_v39  ;;  %v4390_v39 = vld [vmem:[%s6347_s5 + $0xd] ss:$0 sm:$0xff] }
 0x1e4   : > { %v1740_v2 = vadd.f32 %v4390_v39, %v6017_v9 }
 0x1e7   : > { %v2688_v40 = vpop.f32.mrb[26].mxu1 }
 0x1e8   : > { %v2689_v41 = vadd.f32 %v2688_v40, %v580_v31  ;;  %v4910_v42 = vpop.f32.mrb[27].mxu1  ;;  %v4412_v40 = vld [vmem:[%s6349_s7 + $0x3] ss:$0 sm:$0xff] }
 0x1e9   : > { %v4414_v42 = vld [vmem:[%s6349_s7 + $0x5] ss:$0 sm:$0xff] }
 0x1ea   : > { %v2847_v43 = vsel %vm2539_vm2, %v2689_v41, -inf }
 0x1eb   : > { %2848 = vmax.xlane.f32.xlu0 %v2847_v43  ;;  %v2391_v43 = vadd.f32 %v4414_v42, %v6033_v27 }
 0x1ef   : > { %v2840_v44 = vpop.f32.mrb[28].mxu1 }
 0x1f0   : > { %v2841_v45 = vadd.f32 %v2840_v44, %v580_v31  ;;  %v4920_v46 = vpop.f32.mrb[29].mxu1 }
 0x1f1   : > { %v2536_v46 = vld [vmem:[%s6350_s8 + $0x10] sm:$0xff] }
 0x1f2   : > { %v2853_v47 = vsel %vm2539_vm2, %v2841_v45, -inf }
 0x1f3   : > { %2854 = vmax.xlane.f32.xlu1 %v2853_v47  ;;  %v2537_v47 = vld [vmem:[%s6350_s8 + $0x18] sm:$0xff] }
 0x268   : > { %v2846_v48 = vpop.xlane.xlu0 %2845 }
 0x269   : > { %v2856_v49 = vsub.f32 %v2613_v33, %v2846_v48  ;;  %v4409_v33 = vld [vmem:[%s6349_s7] ss:$0 sm:$0xff]  ;;  %v5181_v48 = vpack.c.bf16 %v2537_v47, %v2536_v46 }
 0x26a   : > { %v2041_v5 = vadd.f32 %v4409_v33, %v6019_v12 }
 0x26b   : > { %v2860_v50 = vmul.f32 1.442695, %v2856_v49 }
 0x26d   : > { %5252 = vpow2.f32 %v2860_v50 }
 0x270   : > { %v2852_v51 = vpop.xlane.xlu1 %2851 }
 0x271   : > { %v2858_v52 = vsub.f32 %v2765_v37, %v2852_v51  ;;  %v4410_v37 = vld [vmem:[%s6349_s7 + $0x1] ss:$0 sm:$0xff] }
 0x272   : > { %v2111_v12 = vadd.f32 %v4410_v37, %v6025_v19  ;;  %v2251_v19 = vadd.f32 %v4412_v40, %v6029_v23  ;;  %v2534_v23 = vld [vmem:[%s6350_s8] sm:$0xff] }
 0x273   : > { %v2864_v53 = vmul.f32 1.442695, %v2858_v52 }
 0x275   : > { %5254 = vpow2.f32 %v2864_v53 }
 0x277   : > { %v5253_v54 = vpop.eup %5252 }
 0x278   : > { %v2849_v55 = vpop.xlane.xlu0 %2848  ;;  %v2868_v57 = vsel %vm2539_vm2, %v5253_v54, 0.0 }
 0x279   : > { %v2857_v56 = vsub.f32 %v2689_v41, %v2849_v55  ;;  %2869 = vadd.xlane.f32.xlu0 %v2868_v57  ;;  %v4392_v41 = vld [vmem:[%s6347_s5 + $0xf] ss:$0 sm:$0xff] }
 0x27a   : > { %v1880_v9 = vadd.f32 %v4392_v41, %v6021_v14  ;;  %v2535_v14 = vld [vmem:[%s6350_s8 + $0x8] sm:$0xff] }
 0x27b   : > { %v2862_v58 = vmul.f32 1.442695, %v2857_v56  ;;  %v5178_v44 = vpack.c.bf16 %v2535_v14, %v2534_v23 }
 0x27d   : > { %5256 = vpow2.f32 %v2862_v58 }
 0x27f   : > { %v5255_v59 = vpop.eup %5254 }
 0x280   : > { %v2855_v61 = vpop.xlane.xlu1 %2854  ;;  %v2874_v62 = vsel %vm2539_vm2, %v5255_v59, 0.0 }
 0x281   : > { %v2859_v18 = vsub.f32 %v2841_v45, %v2855_v61  ;;  %2875 = vadd.xlane.f32.xlu0 %v2874_v62 }
 0x283   : > { %v2866_v63 = vmul.f32 1.442695, %v2859_v18  ;;  %v581_v18 = vld [vmem:[%s577_s29] sm:$0xff] }
 0x285   : > { %5258 = vpow2.f32 %v2866_v63 }
 0x287   : > { %v5257_v0 = vpop.eup %5256 }
 0x288   : > { %v2871_v1 = vsel %vm2539_vm2, %v5257_v0, 0.0 }
 0x289   : > { %2872 = vadd.xlane.f32.xlu1 %v2871_v1 }
 0x28f   : > { %v5259_v4 = vpop.eup %5258 }
 0x290   : > { %v2877_v6 = vsel %vm2539_vm2, %v5259_v4, 0.0 }
 0x291   : > { %2878 = vadd.xlane.f32.xlu1 %v2877_v6 }
 0x306   : > { %v2870_v8 = vpop.xlane.xlu0 %2869 }
 0x307   : > { %5260 = vrcp.f32 %v2870_v8 }
 0x30e   : > { %v2876_v10 = vpop.xlane.xlu0 %2875 }
 0x30f   : > { %5262 = vrcp.f32 %v2876_v10  ;;  %v4411_v10 = vld [vmem:[%s6349_s7 + $0x2] ss:$0 sm:$0xff] }
 0x311   : > { %v5261_v15 = vpop.eup %5260 }
 0x312   : > { %v2884_v17 = vmul.f32 %v5261_v15, %v5253_v54 }
 0x314   : > { %4924 = vmatmul.mubr.msk.f32.vlgmr.msra.gmra.mrb[26].mxu0 %vm2539_vm2, %v2884_v17  ;;  %v4391_v17 = vld [vmem:[%s6347_s5 + $0xe] ss:$0 sm:$0xff] }
 0x315   : > { %4932 = vmatpush3.msra.mxu0 %v1530_v20  ;;  %4933 = vmatprep.mubr.msk.f32.mxu0 %vm5356_vm0, %v5357_v11  ;;  %v2181_v20 = vadd.f32 %v4411_v10, %v6023_v16 }
 0x316   : > { %v2873_v22 = vpop.xlane.xlu1 %2872  ;;  %5177 = vmatprep.subr.bf16.mxu0 %v5355_v3 }
 0x317   : > { %5264 = vrcp.f32 %v2873_v22 }
 0x319   : > { %v5263_v24 = vpop.eup %5262 }
 0x31a   : > { %v2886_v26 = vmul.f32 %v5263_v24, %v5255_v59  ;;  %v4413_v24 = vld [vmem:[%s6349_s7 + $0x4] ss:$0 sm:$0xff] }
 0x31c   : > { %4934 = vmatmul.mubr.msk.f32.vlgmr.msra.gmra.mrb[28].mxu0 %vm2539_vm2, %v2886_v26  ;;  %v1810_v26 = vadd.f32 %v4391_v17, %v6015_v7 }
 0x31d   : > { %4949 = vmatprep.mubr.msk.f32.mxu0 %vm5356_vm0, %v5357_v11  ;;  %5179 = vmatpush3.bf16.msra.mxu0 %v5178_v44 }
 0x31e   : > { %v2879_v28 = vpop.xlane.xlu1 %2878  ;;  %5180 = vmatprep.subr.bf16.mxu0 %v5355_v3 }
 0x31f   : > { %5266 = vrcp.f32 %v2879_v28  ;;  %v2321_v28 = vadd.f32 %v4413_v24, %v6027_v21 }
 0x321   : > { %v5265_v30 = vpop.eup %5264  ;;  %5182 = vmatpush3.bf16.msra.mxu0 %v5181_v48 }
 0x322   : > { %v2885_v31 = vmul.f32 %v5265_v30, %v5257_v0  ;;  %4962 = vmatprep.subr.mxu0 %v5357_v11 }
 0x324   : > { %4929 = vmatmul.mubr.msk.f32.vlgmr.msra.gmra.mrb[30].mxu1 %vm2539_vm2, %v2885_v31 }
 0x325   : > { %4937 = vmatpush3.msra.mxu1 %v1600_v32  ;;  %4938 = vmatprep.mubr.msk.f32.mxu1 %vm5356_vm0, %v5357_v11 }
 0x326   : > { %4952 = vmatprep.subr.mxu1 %v5357_v11 }
 0x329   : > { %v5267_v34 = vpop.eup %5266 }
 0x32a   : > { %v2887_v35 = vmul.f32 %v5267_v34, %v5259_v4 }
 0x32c   : > { %4939 = vmatmul.mubr.msk.f32.vlgmr.msra.gmra.mrb[32].mxu1 %vm2539_vm2, %v2887_v35 }
 0x32d   : > { %4953 = vmatpush3.xpose.msk.msra.mxu1 %vm2539_vm2, %v2041_v5  ;;  %4954 = vmatprep.mubr.msk.f32.mxu1 %vm5356_vm0, %v5357_v11 }
 0x32e   : > { %4957 = vmatprep.subr.mxu1 %v5357_v11 }
 0x330   : > { %4955 = vmatmul.mubr.msk.f32.vlgmr.msra.gmra.mrb[34].mxu1 %vm2539_vm2, %v1670_v38 }
 0x331   : > { %4958 = vmatpush3.xpose.msk.msra.mxu1 %vm2539_vm2, %v2111_v12  ;;  %4959 = vmatprep.mubr.msk.f32.mxu1 %vm5356_vm0, %v5357_v11 }
 0x332   : > { %4967 = vmatprep.subr.mxu1 %v5357_v11 }
 0x334   : > { %4960 = vmatmul.mubr.msk.f32.vlgmr.msra.gmra.mrb[36].mxu1 %vm2539_vm2, %v1740_v2 }
 0x335   : > { %4968 = vmatpush3.xpose.msk.msra.mxu1 %vm2539_vm2, %v2251_v19  ;;  %4969 = vmatprep.mubr.msk.f32.mxu1 %vm5356_vm0, %v5357_v11  ;;  %v4415_v19 = vld [vmem:[%s6349_s7 + $0x6] ss:$0 sm:$0xff] }
 0x336   : > { %4977 = vmatprep.subr.mxu1 %v5357_v11 }
 0x338   : > { %4970 = vmatmul.mubr.msk.f32.vlgmr.msra.gmra.mrb[38].mxu1 %vm2539_vm2, %v1880_v9 }
 0x339   : > { %4978 = vmatpush3.msra.mxu1 %v2391_v43  ;;  %4979 = vmatprep.mubr.msk.f32.mxu1 %vm5356_vm0, %v5357_v11  ;;  %v2461_v43 = vadd.f32 %v4415_v19, %v6031_v25 }
 0x33a   : > { %4987 = vmatprep.subr.mxu1 %v5357_v11 }
 0x3e7   : > { %v2957_v27 = vpop.f32.mrb[26].mxu0 }
 0x3e8   : > { %v4925_v45 = vpop.f32.mrb[27].mxu0 }
 0x3ef   : > { %v3103_v49 = vpop.f32.mrb[28].mxu0 }
 0x3f0   : > { %v4935_v50 = vpop.f32.mrb[29].mxu0  ;;  %3185 = vrot.lane.b32.xlu1 %v3103_v49, %s5358_s17 }
 0x3f1   : > { %v4416_v50 = vld [vmem:[%s6349_s7 + $0x7] ss:$0 sm:$0xff] }
 0x3f7   : > { %v3030_v51 = vpop.f32.mrb[30].mxu1 }
 0x3f8   : > { %3181 = vrot.lane.b32.xlu0 %v3030_v51, %s5359_s1  ;;  %v4930_v52 = vpop.f32.mrb[31].mxu1 }
 0x3ff   : > { %v3176_v53 = vpop.f32.mrb[32].mxu1 }
 0x400   : > { %3189 = vrot.lane.b32.xlu1 %v3176_v53, %s5360_s0  ;;  %v4940_v54 = vpop.f32.mrb[33].mxu1 }
 0x401   : > { %v2531_v54 = vadd.f32 %v4416_v50, %v6035_v29 }
 0x403   : > { %v3381_v55 = vpop.f32.mrb[34].mxu1 }
 0x404   : > { %v4956_v56 = vpop.f32.mrb[35].mxu1  ;;  %v3382_v0 = vadd.f32 %v3381_v55, %v581_v18 }
 0x406   : > { %v3613_v1 = vsel %vm2539_vm2, %v3382_v0, -inf }
 0x407   : > { %v3457_v57 = vpop.f32.mrb[36].mxu1 }
 0x408   : > { %v4961_v58 = vpop.f32.mrb[37].mxu1  ;;  %v3458_v62 = vadd.f32 %v3457_v57, %v581_v18 }
 0x40a   : > { %v3616_v63 = vsel %vm2539_vm2, %v3458_v62, -inf }
 0x40b   : > { %v3609_v59 = vpop.f32.mrb[38].mxu1 }
 0x40c   : > { %v4971_v61 = vpop.f32.mrb[39].mxu1  ;;  %v3610_v38 = vadd.f32 %v3609_v59, %v581_v18 }
 0x40e   : > { %v3622_v40 = vsel %vm2539_vm2, %v3610_v38, -inf }
 0x417   : > { %3617 = vmax.xlane.f32.xlu0 %v3616_v63 }
 0x424   : > { %3614 = vmax.xlane.f32.xlu1 %v3613_v1  ;;  %v3305_v1 = vld [vmem:[%s6352_s10 + $0x8] sm:$0xff] }
 0x462   : > { %v3186_v6 = vpop.permute.xlu1 %3185 }
 0x46a   : > { %v3182_v4 = vpop.permute.xlu0 %3181 }
 0x46b   : > { %v3192_v8 = vsel %vm2539_vm2, %v2957_v27, %v3182_v4 }
 0x46c   : > { %v3194_v13 = vsel %vm3193_vm3, %v3192_v8, %v3186_v6  ;;  %v3306_v6 = vld [vmem:[%s6352_s10 + $0x10] sm:$0xff]  ;;  %v3307_v8 = vld [vmem:[%s6352_s10 + $0x18] sm:$0xff] }
 0x46d   : > { %v5187_v10 = vpack.c.bf16 %v3307_v8, %v3306_v6 }
 0x472   : > { %v3190_v15 = vpop.permute.xlu1 %3189 }
 0x473   : > { %v3196_v22 = vsel %vm3195_vm4, %v3194_v13, %v3190_v15 }
 0x474   : > { %4950 = vmatmul.mubr.msk.f32.vlgmr.msra.gmra.mrb[30].mxu0 %vm759_vm1, %v3196_v22  ;;  %v4437_v22 = vld [vmem:[%s6351_s9] ss:$0 sm:$0xff] }
 0x475   : > { %4963 = vmatpush3.xpose.msk.msra.mxu0 %vm2539_vm2, %v2181_v20  ;;  %4964 = vmatprep.mubr.msk.f32.mxu0 %vm5356_vm0, %v5357_v11 }
 0x476   : > { %4972 = vmatprep.subr.mxu0 %v5357_v11 }
 0x478   : > { %4965 = vmatmul.mubr.msk.f32.vlgmr.msra.gmra.mrb[32].mxu0 %vm2539_vm2, %v1810_v26  ;;  %v5290_v26 = vld [vmem:[%s5552_s27] sm:$0xff]  ;;  %s4273_s27 = scalar_lea.sflag [#allocation3], %s563_s30 }
 0x479   : > { %4973 = vmatpush3.msra.mxu0 %v2321_v28  ;;  %4974 = vmatprep.mubr.msk.f32.mxu0 %vm5356_vm0, %v5357_v11 }
 0x47a   : > { %4982 = vmatprep.subr.mxu0 %v5357_v11 }
 0x4a4   : > { %v3618_v7 = vpop.xlane.xlu0 %3617 }
 0x4a5   : > { %v3626_v33 = vsub.f32 %v3458_v62, %v3618_v7 }
 0x4a7   : > { %v3631_v34 = vmul.f32 1.442695, %v3626_v33 }
 0x4b1   : > { %v3615_v16 = vpop.xlane.xlu1 %3614 }
 0x4b2   : > { %v3625_v60 = vsub.f32 %v3382_v0, %v3615_v16  ;;  %v3304_v0 = vld [vmem:[%s6352_s10] sm:$0xff] }
 0x4b3   : > { %v5184_v4 = vpack.c.bf16 %v3305_v1, %v3304_v0  ;;  %v4159_v0 = vld [vmem:[%s6357_s15 + $0x20] sm:$0xff]  ;;  %v4160_v1 = vld [vmem:[%s6357_s15 + $0x28] sm:$0xff] }
 0x4b4   : > { %v3629_v30 = vmul.f32 1.442695, %v3625_v60 }
 0x4b6   : > { %5268 = vpow2.f32 %v3629_v30 }
 0x4b7   : > { %5270 = vpow2.f32 %v3631_v34 }
 0x4c0   : > { %v5269_v31 = vpop.eup %5268 }
 0x4c1   : > { %v3637_v32 = vsel %vm2539_vm2, %v5269_v31, 0.0  ;;  %v5271_v2 = vpop.eup %5270 }
 0x4c2   : > { %3638 = vadd.xlane.f32.xlu1 %v3637_v32  ;;  %v3640_v41 = vsel %vm2539_vm2, %v5271_v2, 0.0 }
 0x547   : > { %v6162_v21 = vpop.f32.mrb[30].mxu0 }
 0x548   : > { %v4951_v35 = vpop.f32.mrb[31].mxu0  ;;  %v3273_v24 = vadd.f32 %v4437_v22, %v6162_v21 }
 0x54a   : > { %v3276_v28 = vadd.f32 %v5290_v26, %v3273_v24 }
 0x54b   : > { %v3533_v36 = vpop.f32.mrb[32].mxu0 }
 0x54c   : > { %v3534_v5 = vadd.f32 %v3533_v36, %v581_v18  ;;  %v4966_v37 = vpop.f32.mrb[33].mxu0  ;;  %v3282_v16 = vmul.f32 %v3276_v28, %v3276_v28  ;;  %v3277_v30 = vsel %vm759_vm1, %v3276_v28, 0.0 }
 0x54e   : > { %v3619_v39 = vsel %vm2539_vm2, %v3534_v5, -inf  ;;  %v3283_v60 = vsel %vm759_vm1, %v3282_v16, 0.0 }
 0x54f   : > { %v3639_v12 = vpop.xlane.xlu1 %3638  ;;  %3620 = vmax.xlane.f32.xlu0 %v3619_v39 }
 0x550   : > { %5272 = vrcp.f32 %v3639_v12 }
 0x553   : > { %3623 = vmax.xlane.f32.xlu0 %v3622_v40 }
 0x557   : > { %3641 = vadd.xlane.f32.xlu0 %v3640_v41 }
 0x55a   : > { %v5273_v42 = vpop.eup %5272 }
 0x55b   : > { %v3653_v9 = vmul.f32 %v5273_v42, %v5269_v31 }
 0x55d   : > { %4975 = vmatmul.mubr.msk.f32.vlgmr.msra.gmra.mrb[34].mxu0 %vm2539_vm2, %v3653_v9  ;;  %v6227_v9 = vld [vmem:[%s6354_s12] sm:$0x3f] }
 0x55e   : > { %4983 = vmatpush3.msra.mxu0 %v2461_v43  ;;  %4984 = vmatprep.mubr.msk.f32.mxu0 %vm5356_vm0, %v5357_v11 }
 0x55f   : > { %5183 = vmatprep.subr.bf16.mxu0 %v5355_v3 }
 0x5dc   : > { %v3621_v23 = vpop.xlane.xlu0 %3620 }
 0x5dd   : > { %v3627_v14 = vsub.f32 %v3534_v5, %v3621_v23 }
 0x5df   : > { %v3633_v44 = vmul.f32 1.442695, %v3627_v14 }
 0x5e0   : > { %v3624_v27 = vpop.xlane.xlu0 %3623 }
 0x5e1   : > { %5274 = vpow2.f32 %v3633_v44  ;;  %v3628_v45 = vsub.f32 %v3610_v38, %v3624_v27 }
 0x5e3   : > { %v3635_v46 = vmul.f32 1.442695, %v3628_v45  ;;  %v4451_v45 = vld [vmem:[%s6353_s11] ss:$0 sm:$0xff] }
 0x5e4   : > { %v3642_v47 = vpop.xlane.xlu0 %3641 }
 0x5e5   : > { %5276 = vpow2.f32 %v3635_v46 }
 0x5e6   : > { %5278 = vrcp.f32 %v3642_v47 }
 0x5eb   : > { %v5275_v48 = vpop.eup %5274 }
 0x5ec   : > { %v3643_v25 = vsel %vm2539_vm2, %v5275_v48, 0.0 }
 0x5ed   : > { %3644 = vadd.xlane.f32.xlu1 %v3643_v25 }
 0x5ef   : > { %v5277_v49 = vpop.eup %5276 }
 0x5f0   : > { %v5279_v51 = vpop.eup %5278  ;;  %v3646_v52 = vsel %vm2539_vm2, %v5277_v49, 0.0 }
 0x5f1   : > { %v3654_v53 = vmul.f32 %v5279_v51, %v5271_v2  ;;  %3647 = vadd.xlane.f32.xlu0 %v3646_v52  ;;  %v3294_v2 = vlaneseq }
 0x5f3   : > { %4980 = vmatmul.mubr.msk.f32.vlgmr.msra.gmra.mrb[40].mxu1 %vm2539_vm2, %v3654_v53  ;;  %v6221_v41 = vshrl.u32 %v3294_v2, 7  ;;  %v4070_v53 = vld [vmem:[%s6355_s13] sm:$0xff] }
 0x5f4   : > { %4988 = vmatpush3.msra.mxu1 %v2531_v54  ;;  %4989 = vmatprep.mubr.msk.f32.mxu1 %vm5356_vm0, %v5357_v11  ;;  %v4071_v54 = vld [vmem:[%s6355_s13 + $0x8] sm:$0xff] }
 0x5f5   : > { %5189 = vmatprep.subr.bf16.mxu1 %v5355_v3  ;;  %v3296_v19 = vsub.s32 0, %v6221_v41  ;;  %v3301_v14 = vsub.s32 1, %v6221_v41  ;;  %v4062_v24 = vsub.s32 2, %v6221_v41  ;;  %v4067_v26 = vsub.s32 3, %v6221_v41 }
 0x5f7   : > { %v3297_v23 = vrot.slane %v6227_v9, %v3296_v19  ;;  %v3302_v27 = vrot.slane %v6227_v9, %v3301_v14  ;;  %v4063_v16 = vrot.slane %v6227_v9, %v4062_v24 }
 0x630   : > { %v3726_v55 = vpop.f32.mrb[34].mxu0 }
 0x631   : > { %v4976_v56 = vpop.f32.mrb[35].mxu0 }
 0x632   : > { %v4072_v56 = vld [vmem:[%s6355_s13 + $0x10] sm:$0xff] }
 0x67a   : > { %v3645_v57 = vpop.xlane.xlu1 %3644 }
 0x67b   : > { %5280 = vrcp.f32 %v3645_v57  ;;  %v4073_v57 = vld [vmem:[%s6355_s13 + $0x18] sm:$0xff] }
 0x67e   : > { %v3648_v58 = vpop.xlane.xlu0 %3647 }
 0x67f   : > { %5282 = vrcp.f32 %v3648_v58  ;;  %v5193_v58 = vpack.c.bf16 %v4073_v57, %v4072_v56 }
 0x685   : > { %v5281_v59 = vpop.eup %5280 }
 0x686   : > { %v3655_v61 = vmul.f32 %v5281_v59, %v5275_v48  ;;  %v4155_v59 = vld [vmem:[%s6357_s15] sm:$0xff] }
 0x688   : > { %4985 = vmatmul.mubr.msk.f32.vlgmr.msra.gmra.mrb[36].mxu0 %vm2539_vm2, %v3655_v61  ;;  %v4156_v61 = vld [vmem:[%s6357_s15 + $0x8] sm:$0xff] }
 0x689   : > { %v5283_v18 = vpop.eup %5282  ;;  %5000 = vmatprep.mubr.msk.f32.mxu0 %vm5356_vm0, %v5357_v11  ;;  %5185 = vmatpush3.bf16.msra.mxu0 %v5184_v4  ;;  %v5202_v4 = vpack.c.bf16 %v4160_v1, %v4159_v0 }
 0x68a   : > { %v3656_v29 = vmul.f32 %v5283_v18, %v5277_v49  ;;  %5186 = vmatprep.subr.bf16.mxu0 %v5355_v3  ;;  %v4157_v18 = vld [vmem:[%s6357_s15 + $0x10] sm:$0xff] }
 0x68c   : > { %4990 = vmatmul.mubr.msk.f32.vlgmr.msra.gmra.mrb[42].mxu1 %vm2539_vm2, %v3656_v29  ;;  %v5196_v29 = vpack.c.bf16 %v4156_v61, %v4155_v59 }
 0x68d   : > { %5011 = vmatprep.mubr.msk.f32.mxu1 %vm5356_vm0, %v5357_v11  ;;  %5188 = vmatpush3.bf16.msra.mxu0 %v5187_v10 }
 0x68e   : > { %5195 = vmatprep.subr.bf16.mxu0 %v5355_v3 }
 0x6c6   : > { %v3799_v62 = vpop.f32.mrb[40].mxu1 }
 0x6c7   : > { %3950 = vrot.lane.b32.xlu1 %v3799_v62, %s5359_s1  ;;  %v4981_v63 = vpop.f32.mrb[41].mxu1  ;;  %v4158_v62 = vld [vmem:[%s6357_s15 + $0x18] sm:$0xff] }
 0x6c8   : > { %v5199_v63 = vpack.c.bf16 %v4158_v62, %v4157_v18 }
 0x739   : > { %v3951_v31 = vpop.permute.xlu1 %3950 }
 0x73a   : > { %v3961_v7 = vsel %vm2539_vm2, %v3726_v55, %v3951_v31  ;;  %v5190_v55 = vpack.c.bf16 %v4071_v54, %v4070_v53 }
 0x73c   : > { %5191 = vmatpush3.bf16.msra.mxu1 %v5190_v55 }
 0x73d   : > { %5192 = vmatprep.subr.bf16.mxu1 %v5355_v3 }
 0x740   : > { %5194 = vmatpush3.bf16.msra.mxu1 %v5193_v58 }
 0x75b   : > { %v3872_v13 = vpop.f32.mrb[36].mxu0 }
 0x75c   : > { %v4986_v15 = vpop.f32.mrb[37].mxu0  ;;  %3954 = vrot.lane.b32.xlu0 %v3872_v13, %s5358_s17  ;;  %s5291_s17 = scalar_lea.vmem %s6301_s26, 128 }
 0x75d   : > { %p5292_p11 = scmp.ne.s32.totalorder %s6301_s26, %s5291_s17 }
 0x75f   : > { %v3945_v17 = vpop.f32.mrb[42].mxu1  ;;  %p5293_p12 = pnand %p5292_p11, %p5490_p5 }
 0x760   : > { %3958 = vrot.lane.b32.xlu1 %v3945_v17, %s5360_s0  ;;  %v4991_v20 = vpop.f32.mrb[43].mxu1  ;;  %s5295_s0 = sshll.u32 %s5361_s28, 4  ;;  %s5296_s0 = int_to_ptr.vmem [resolvable:$false] %s5295_s0 }
 0x761   : > { %p5294_p13 = pneg %p5293_p12  ;;  %s5297_s29 = scalar_lea.vmem %s5296_s0, 256 }
 0x762   : > { %p5298_p0 = scmp.lt.s32.totalorder %s6301_s26, %s5296_s0  ;;  %p5299_p1 = scmp.lt.s32.totalorder %s5297_s29, %s5291_s17 }
 0x764   : > { %p5300_p2 = por %p5299_p1, %p5298_p0 }
 0x766   : > { %p5301_p3 = pnand %p5300_p2, %p5294_p13 }
 0x77b   : > { %3284 = vadd.xlane.f32.xlu0 %v3283_v60 }
 0x784   : > { %3278 = vadd.xlane.f32.xlu1 %v3277_v30 }
 0x7ce   : > { %v3955_v32 = vpop.permute.xlu0 %3954 }
 0x7cf   : > { %v3962_v33 = vsel %vm3193_vm3, %v3961_v7, %v3955_v32  ;;  %v4161_v7 = vld [vmem:[%s6357_s15 + $0x30] sm:$0xff] }
 0x7d2   : > { %v3959_v34 = vpop.permute.xlu1 %3958 }
 0x7d3   : > { %v3963_v35 = vsel %vm3195_vm4, %v3962_v33, %v3959_v34  ;;  %v4162_v33 = vld [vmem:[%s6357_s15 + $0x38] sm:$0xff] }
 0x7d4   : > { %5001 = vmatmul.mubr.msk.f32.vlgmr.msra.gmra.mrb[38].mxu0 %vm759_vm1, %v3963_v35  ;;  %v5205_v34 = vpack.c.bf16 %v4162_v33, %v4161_v7  ;;  %v4453_v35 = vld [vmem:[%s6356_s14] ss:$0 sm:$0xff] }
 0x7d5   : > { %5030 = vmatprep.mubr.msk.f32.mxu0 %vm5356_vm0, %v5357_v11  ;;  %5197 = vmatpush3.bf16.msra.mxu0 %v5196_v29 }
 0x7d6   : > { %5198 = vmatprep.subr.bf16.mxu0 %v5355_v3 }
 0x7d9   : > { %5200 = vmatpush3.bf16.msra.mxu0 %v5199_v63 }
 0x7da   : > { %5201 = vmatprep.subr.bf16.mxu0 %v5355_v3 }
 0x7dd   : > { %5203 = vmatpush3.bf16.msra.mxu0 %v5202_v4 }
 0x7de   : > { %5204 = vmatprep.subr.bf16.mxu0 %v5355_v3  ;;  %v4068_v3 = vrot.slane %v6227_v9, %v4067_v26 }
 0x7e1   : > { %5206 = vmatpush3.bf16.msra.mxu0 %v5205_v34 }
 0x808   : > { %v3285_v5 = vpop.xlane.xlu0 %3284 }
 0x809   : > { %v3286_v38 = vmul.f32 0.03125, %v3285_v5 }
 0x811   : > { %v3279_v21 = vpop.xlane.xlu1 %3278 }
 0x812   : > { %v3281_v36 = vmul.f32 0.03125, %v3279_v21 }
 0x814   : > { %v3287_v37 = vmul.f32 %v3281_v36, %v3281_v36  ;;  %v3290_v11 = vsub.f32 %v3276_v28, %v3281_v36 }
 0x816   : > { %v3288_v39 = vsub.f32 %v3286_v38, %v3287_v37  ;;  %v4455_v38 = vld [vmem:[%s6358_s16] ss:$0 sm:$0xff] }
 0x818   : > { %v3289_v12 = vmax.f32 %v3288_v39, 0.0 }
 0x81a   : > { %v3291_v40 = vadd.f32 1e-05, %v3289_v12 }
 0x81c   : > { %5284 = vrsqrt.f32 %v3291_v40 }
 0x826   : > { %v5285_v42 = vpop.eup %5284 }
 0x827   : > { %v3293_v43 = vmul.f32 %v5285_v42, %v3290_v11 }
 0x829   : > { %v3298_v44 = vmul.f32 %v3297_v23, %v3293_v43 }
 0x82b   : > { %v3303_v47 = vadd.f32 %v3302_v27, %v3298_v44 }
 0x8a7   : > { %v4039_v46 = vpop.f32.mrb[38].mxu0 }
 0x8a8   : > { %v4040_v48 = vadd.f32 %v4451_v45, %v4039_v46  ;;  %v5002_v25 = vpop.f32.mrb[39].mxu0 }
 0x8a9   : > { %v4268_v25 = vsub.s32 5, %v6221_v41 }
 0x8aa   : > { %v4043_v49 = vadd.f32 %v4040_v48, %v3303_v47  ;;  %v4263_v48 = vsub.s32 4, %v6221_v41 }
 0x8ab   : > { %v4269_v53 = vrot.slane %v6227_v9, %v4268_v25 }
 0x8ac   : > { %v4044_v50 = vsel %vm759_vm1, %v4043_v49, 0.0  ;;  %v4048_v51 = vmul.f32 %v4043_v49, %v4043_v49 }
 0x8ad   : > { %4045 = vadd.xlane.f32.xlu0 %v4044_v50  ;;  %v4264_v50 = vrot.slane %v6227_v9, %v4263_v48 }
 0x8ae   : > { %v4049_v52 = vsel %vm759_vm1, %v4048_v51, 0.0 }
 0x8af   : > { %4050 = vadd.xlane.f32.xlu1 %v4049_v52 }
 0x93a   : > { %v4046_v6 = vpop.xlane.xlu0 %4045 }
 0x93b   : > { %v4047_v8 = vmul.f32 0.03125, %v4046_v6 }
 0x93c   : > { %v4051_v10 = vpop.xlane.xlu1 %4050 }
 0x93d   : > { %v4053_v13 = vmul.f32 %v4047_v8, %v4047_v8  ;;  %v4052_v15 = vmul.f32 0.03125, %v4051_v10  ;;  %v4056_v28 = vsub.f32 %v4043_v49, %v4047_v8 }
 0x93f   : > { %v4054_v17 = vsub.f32 %v4052_v15, %v4053_v13 }
 0x941   : > { %v4055_v20 = vmax.f32 %v4054_v17, 0.0 }
 0x943   : > { %v4057_v22 = vadd.f32 1e-05, %v4055_v20 }
 0x945   : > { %5286 = vrsqrt.f32 %v4057_v22 }
 0x94f   : > { %v5287_v60 = vpop.eup %5286 }
 0x950   : > { %v4059_v30 = vmul.f32 %v5287_v60, %v4056_v28 }
 0x952   : > { %v4064_v31 = vmul.f32 %v4063_v16, %v4059_v30 }
 0x954   : > { %v4069_v32 = vadd.f32 %v4068_v3, %v4064_v31 }
 0x956   : > { %5012 = vmatmul.mubr.msk.f32.vlgmr.msra.gmra.mrb[44].mxu1 %vm759_vm1, %v4069_v32 }
 0xa29   : > { %v4150_v21 = vpop.f32.mrb[44].mxu1 }
 0xa2a   : > { %v4151_v36 = vadd.f32 %v4453_v35, %v4150_v21  ;;  %v5013_v5 = vpop.f32.mrb[45].mxu1 }
 0xa2c   : > { %v4154_v37 = vmax.f32 %v4151_v36, 0.0 }
 0xa2e   : > { %5031 = vmatmul.mubr.msk.f32.vlgmr.msra.gmra.mrb[40].mxu0 %vm4170_vm5, %v4154_v37 }
 0xb01   : > { %v4240_v39 = vpop.f32.mrb[40].mxu0 }
 0xb02   : > { %v4241_v12 = vadd.f32 %v4455_v38, %v4240_v39  ;;  %v5032_v40 = vpop.f32.mrb[41].mxu0 }
 0xb04   : > { %v4244_v2 = vadd.f32 %v4241_v12, %v4069_v32 }
 0xb06   : > { %v4245_v19 = vsel %vm759_vm1, %v4244_v2, 0.0  ;;  %v4249_v42 = vmul.f32 %v4244_v2, %v4244_v2 }
 0xb07   : > { %4246 = vadd.xlane.f32.xlu0 %v4245_v19 }
 0xb08   : > { %v4250_v11 = vsel %vm759_vm1, %v4249_v42, 0.0 }
 0xb09   : > { %4251 = vadd.xlane.f32.xlu1 %v4250_v11 }
 0xb94   : > { %v4247_v43 = vpop.xlane.xlu0 %4246 }
 0xb95   : > { %v4248_v23 = vmul.f32 0.03125, %v4247_v43 }
 0xb96   : > { %v4252_v14 = vpop.xlane.xlu1 %4251 }
 0xb97   : > { %v4254_v44 = vmul.f32 %v4248_v23, %v4248_v23  ;;  %v4253_v27 = vmul.f32 0.03125, %v4252_v14  ;;  %v4257_v49 = vsub.f32 %v4244_v2, %v4248_v23 }
 0xb99   : > { %v4255_v45 = vsub.f32 %v4253_v27, %v4254_v44 }
 0xb9b   : > { %v4256_v46 = vmax.f32 %v4255_v45, 0.0 }
 0xb9d   : > { %v4258_v47 = vadd.f32 1e-05, %v4256_v46 }
 0xb9f   : > { %5288 = vrsqrt.f32 %v4258_v47 }
 0xba9   : > { %v5289_v51 = vpop.eup %5288 }
 0xbaa   : > { %v4260_v52 = vmul.f32 %v5289_v51, %v4257_v49 }
 0xbac   : > { %v4265_v54 = vmul.f32 %v4264_v50, %v4260_v52 }
 0xbae   : > { %v4270_v55 = vadd.f32 %v4269_v53, %v4265_v54 }
 0xbb0   : > { %4271 = vst.msk [vmem:[%s565_s21] sm:$0xff] %vm759_vm1, %v4270_v55 }
 0xbb1   : > { %5304 = shalt.err (!%p5301_p3)
}
 0xbb2   : > { %s5305_s30 = scalar_lea.hbm %s6299_s24, 128  ;;  %s5309_s21 = scalar_lea.hbm %s6384_s23, 256 }
 0xbb3   : > { %p5306_p4 = scmp.ne.s32.totalorder %s6299_s24, %s5305_s30  ;;  %p5310_p9 = scmp.lt.u32.totalorder %s6299_s24, %s6384_s23 }
 0xbb4   : > { %p5311_p10 = scmp.lt.u32.totalorder %s5309_s21, %s5305_s30  ;;  %p5313_p12 = scmp.lt.u32.totalorder %s5305_s30, %s6299_s24 }
 0xbb5   : > { %p5307_p7 = pnand %p5306_p4, %p5490_p5 }
 0xbb6   : > { %p5312_p11 = por %p5311_p10, %p5310_p9 }
 0xbb7   : > { %p5308_p8 = pneg %p5307_p7 }
 0xbb8   : > { %p5314_p13 = por %p5313_p12, %p5312_p11 }
 0xbba   : > { %p5315_p0 = pnand %p5314_p13, %p5308_p8 }
 0xbbc   : > { %5318 = shalt.err (!%p5315_p0)
}
 0xbbd   : > { %5207 = dma.vmem_to_hbm [thread:$0]  (%p5490_p5), %s6301_s26, 128, %s6299_s24, %s4273_s27  }
 0xbbe PF: > { %s6385_s17 = sld [smem:[#allocation7_spill]]  ;;  %s6386_s28 = sld [smem:[#allocation5_spill]] }
 0xbc4   : > { %p5213_p1 = scmp.ge.s32.totalorder %s6385_s17, 2  ;;  %s4298_s29 = sand.u32 1, %s6386_s28  }
 0xbc5   : > { %s4299_s18 = scalar_lea.sflag [#allocation3], %s4298_s29 }
 0xbc6   : > { %p5210_p2 = pnand %p5213_p1, %p5494_p6 }
 0xbc8   : > { %5336 = dma.done.wait (!%p5210_p2), %s4299_s18, 128  }
 0xbc9   : > { %5338 = vsyncadd (!%p5210_p2), %s4299_s18, 4294967168  ;;  %s6388_s27 = sld [smem:[#allocation8_spill]]  ;;  %s6389_s30 = sld [smem:[#allocation6_spill]] }
 0xbca   : > { %s6390_s26 = sld [smem:[#allocation9_spill]]  ;;  %s6391_s24 = smov %s5345_s25 }
 0xbcf   : > { %p27_p3 = scmp.ge.s32.totalorder %s6388_s27, 4   ;;  %s6392_s25 = smov %s6389_s30 }
 0xbd1   :  { %29 = sbr.rel (!%p27_p3) target bundleno = 7 (0x7), region = 129 }
 0xbd8   :  { %4304 = vsyncpa [#allocation3], 1 }
 0xbd9   :  { %4306 = vsyncpa [#allocation3 + $0x1], 1 }

</bundles_post_ra>
